<compile_context>
chip_gen: v7x
topology: tpu7x:2x2x1
jax: 0.10.0
libtpu: 0.0.40
codegen_flags: <defaults>
</compile_context>

<pallas_src>
import jax
import jax.numpy as jnp
from jax.experimental import pallas as pl
from jax.experimental.pallas import tpu as pltpu

IN_F = 784       # 28*28, fed unpadded (last block dim == full array dim is legal)
H1, H2, H3 = 512, 256, 128
OUT_PAD = 128    # 10 -> 128: lane-dense output (unmasked vst, full MXU tile)


def mlp_kernel(x_ref,
               w1_ref, b1_ref,
               w2_ref, b2_ref,
               w3_ref, b3_ref,
               w4_ref, b4_ref,
               o_ref):
    # x arrives f32 straight from HBM (no wrapper pad/cast pass); cast to bf16
    # in VMEM so the MXU runs at bf16 rate with f32 accumulation.
    x = x_ref[...].astype(jnp.bfloat16)                                 # [TB, 784]

    h = jnp.dot(x, w1_ref[...], preferred_element_type=jnp.float32) + b1_ref[...]
    h = jnp.maximum(h, 0.0).astype(jnp.bfloat16)                        # [TB, 512]

    h = jnp.dot(h, w2_ref[...], preferred_element_type=jnp.float32) + b2_ref[...]
    h = jnp.maximum(h, 0.0).astype(jnp.bfloat16)                        # [TB, 256]

    h = jnp.dot(h, w3_ref[...], preferred_element_type=jnp.float32) + b3_ref[...]
    h = jnp.maximum(h, 0.0).astype(jnp.bfloat16)                        # [TB, 128]

    logits = jnp.dot(h, w4_ref[...], preferred_element_type=jnp.float32) + b4_ref[...]
    o_ref[...] = logits.astype(o_ref.dtype)                             # [TB, 128] f32


def _round_up(x, m):
    return ((x + m - 1) // m) * m


def _pick_tb(B, max_tb=1024):
    """Batch tile: multiple of 128, capped at max_tb.

    For larger batches prefer >=2 grid steps so v7x's two TensorCores both get
    work under dimension_semantics=("parallel",); tiny batches take one
    minimally-padded step (no benefit from splitting them).
    """
    tb_single = _round_up(B, 128)
    if tb_single <= 256:
        return tb_single
    tb_half = _round_up((B + 1) // 2, 128)
    return min(max_tb, tb_half)


def simplenet_forward(x_nchw, params, *, max_tb=1024):
    """x_nchw: [B, 1, 28, 28] float32 -> logits [B, 10] float32."""
    B = x_nchw.shape[0]
    (w1, b1), (w2, b2), (w3, b3), (w4, b4) = params

    TB = _pick_tb(B, max_tb)
    B_pad = _round_up(B, TB)

    # Flatten exactly like torch x.view(-1, 784): contiguous reshape, free.
    x = x_nchw.reshape(B, IN_F)
    if B_pad != B:
        # Zero-pad only the ragged last tile; rows are independent and the
        # padded rows are sliced off below. No-op when B % TB == 0.
        x = jnp.pad(x, ((0, B_pad - B), (0, 0)))

    # Resident bf16 weights (halves resident-weight DMA, doubles MXU rate);
    # pad layer-4 columns 10 -> 128 with zeros so the output is lane-dense.
    w1p = w1.astype(jnp.bfloat16)
    w2p = w2.astype(jnp.bfloat16)
    w3p = w3.astype(jnp.bfloat16)
    w4p = jnp.pad(w4, ((0, 0), (0, OUT_PAD - 10))).astype(jnp.bfloat16)

    b1p = b1.astype(jnp.float32)
    b2p = b2.astype(jnp.float32)
    b3p = b3.astype(jnp.float32)
    b4p = jnp.pad(b4, ((0, 0), (0, OUT_PAD - 10))).astype(jnp.float32)

    def resident(arr):
        # Constant block index across the batch grid axis -> DMA'd once and
        # kept VMEM-resident while x / out tiles stream.
        # NOTE: pipeline_mode=pl.Buffered(1) could reclaim the second (unused)
        # weight buffer (~1.1 MiB); omitted for compile safety — there is
        # ample VMEM headroom at TB <= 1024.
        return pl.BlockSpec(arr.shape, lambda i: (0, 0))

    # Rough per-step VMEM budget: double-buffered f32 x/out tiles, resident
    # bf16 weights (x2 buffers for safety), f32+bf16 intermediates. Setting
    # the limit explicitly mainly matters on v5e (16 MiB scoped default);
    # clamp to [32 MiB, 48 MiB] to stay inside v7x's 64 MiB physical VMEM.
    weight_bytes = 2 * (IN_F * H1 + H1 * H2 + H2 * H3 + H3 * OUT_PAD)
    budget = (2 * TB * IN_F * 4
              + 2 * TB * OUT_PAD * 4
              + 2 * weight_bytes
              + TB * (IN_F * 2 + (H1 + H2 + H3) * 6 + OUT_PAD * 4))
    vmem_limit = max(32 * 1024 * 1024, min(2 * budget, 48 * 1024 * 1024))

    out = pl.pallas_call(
        mlp_kernel,
        out_shape=jax.ShapeDtypeStruct((B_pad, OUT_PAD), jnp.float32),
        grid_spec=pltpu.PrefetchScalarGridSpec(
            num_scalar_prefetch=0,
            grid=(B_pad // TB,),
            in_specs=[
                pl.BlockSpec((TB, IN_F), lambda i: (i, 0)),   # x tile streams
                resident(w1p), resident(b1p),
                resident(w2p), resident(b2p),
                resident(w3p), resident(b3p),
                resident(w4p), resident(b4p),
            ],
            out_specs=pl.BlockSpec((TB, OUT_PAD), lambda i: (i, 0)),
        ),
        compiler_params=pltpu.CompilerParams(
            dimension_semantics=("parallel",),   # v7x: shard batch over both TCs
            vmem_limit_bytes=int(vmem_limit),
        ),
    )(x, w1p, b1p, w2p, b2p, w3p, b3p, w4p, b4p)

    # Strip batch padding and the 10 -> 128 lane padding.
    return out[:B, :10]


def init_params(key):
    """Deterministic init mimicking nn.Linear's U(-1/sqrt(fan_in), 1/sqrt(fan_in)).

    Weights stored [in, out] so the kernel computes x @ W + b.
    """
    dims = [(784, 512), (512, 256), (256, 128), (128, 10)]
    params = []
    for (fan_in, fan_out) in dims:
        key, kw, kb = jax.random.split(key, 3)
        bound = 1.0 / jnp.sqrt(jnp.float32(fan_in))
        w = jax.random.uniform(kw, (fan_in, fan_out), jnp.float32, -bound, bound)
        b = jax.random.uniform(kb, (1, fan_out), jnp.float32, -bound, bound)
        params.append((w, b))
    return params


def reference_forward(x_nchw, params):
    """Pure-JAX f32 reference for sanity checking."""
    B = x_nchw.shape[0]
    h = x_nchw.reshape(B, 784)
    for i, (w, b) in enumerate(params):
        h = h @ w + b
        if i < 3:
            h = jnp.maximum(h, 0.0)
    return h


if __name__ == "__main__":
    key = jax.random.PRNGKey(0)
    key, kx = jax.random.split(key)

    params = init_params(key)
    x = jax.random.normal(kx, (8, 1, 28, 28), jnp.float32)  # MNIST-shaped batch

    out = simplenet_forward(x, params)
    out = jax.block_until_ready(out)

    ref = reference_forward(x, params)
    assert out.shape == (8, 10)
    # bf16 weights/activations (f32 accumulation) -> loosened tolerance vs f32 ref.
    assert jnp.allclose(out, ref, atol=3e-2, rtol=3e-2), "mismatch vs reference"

    print("KERNEL_OK")
</pallas_src>

<mosaic_0001>
module attributes {stable_mosaic.version = 11 : i64} {
  func.func @mlp_kernel(%arg0: i32, %arg1: memref<128x784xf32, #tpu.memory_space<vmem>>, %arg2: memref<784x512xbf16, #tpu.memory_space<vmem>>, %arg3: memref<1x512xf32, #tpu.memory_space<vmem>>, %arg4: memref<512x256xbf16, #tpu.memory_space<vmem>>, %arg5: memref<1x256xf32, #tpu.memory_space<vmem>>, %arg6: memref<256x128xbf16, #tpu.memory_space<vmem>>, %arg7: memref<1x128xf32, #tpu.memory_space<vmem>>, %arg8: memref<128x128xbf16, #tpu.memory_space<vmem>>, %arg9: memref<1x128xf32, #tpu.memory_space<vmem>>, %arg10: memref<128x128xf32, #tpu.memory_space<vmem>>) attributes {dimension_semantics = [#tpu.dimension_semantics<parallel>], iteration_bounds = array<i64: 1>, scalar_prefetch = 0 : i64, scratch_operands = 0 : i64, tpu.core_type = #tpu.core_type<tc>, window_params = [{transform_indices = @transform_0, window_bounds = array<i64: 128, 784>}, {pipeline_mode = #tpu.pipeline_mode<synchronous>, transform_indices = @transform_1, window_bounds = array<i64: 784, 512>}, {pipeline_mode = #tpu.pipeline_mode<synchronous>, transform_indices = @transform_2, window_bounds = array<i64: 1, 512>}, {pipeline_mode = #tpu.pipeline_mode<synchronous>, transform_indices = @transform_3, window_bounds = array<i64: 512, 256>}, {pipeline_mode = #tpu.pipeline_mode<synchronous>, transform_indices = @transform_4, window_bounds = array<i64: 1, 256>}, {pipeline_mode = #tpu.pipeline_mode<synchronous>, transform_indices = @transform_5, window_bounds = array<i64: 256, 128>}, {pipeline_mode = #tpu.pipeline_mode<synchronous>, transform_indices = @transform_6, window_bounds = array<i64: 1, 128>}, {pipeline_mode = #tpu.pipeline_mode<synchronous>, transform_indices = @transform_7, window_bounds = array<i64: 128, 128>}, {pipeline_mode = #tpu.pipeline_mode<synchronous>, transform_indices = @transform_8, window_bounds = array<i64: 1, 128>}, {transform_indices = @transform_9, window_bounds = array<i64: 128, 128>}]} {
    %c0 = arith.constant 0 : index
    %c0_0 = arith.constant 0 : index
    %0 = vector.load %arg1[%c0, %c0_0] : memref<128x784xf32, #tpu.memory_space<vmem>>, vector<128x784xf32>
    %1 = arith.truncf %0 : vector<128x784xf32> to vector<128x784xbf16>
    %c0_1 = arith.constant 0 : index
    %c0_2 = arith.constant 0 : index
    %2 = vector.load %arg2[%c0_1, %c0_2] : memref<784x512xbf16, #tpu.memory_space<vmem>>, vector<784x512xbf16>
    %cst = arith.constant dense<0.000000e+00> : vector<128x512xf32>
    %3 = tpu.matmul %1, %2, %cst {dimension_numbers = #tpu.dot_dimension_numbers<[1], [0], [0], [1], [0, 0, 1, 1], [], []>} : vector<128x784xbf16>, vector<784x512xbf16>, vector<128x512xf32> -> vector<128x512xf32>
    %c0_3 = arith.constant 0 : index
    %c0_4 = arith.constant 0 : index
    %4 = vector.load %arg3[%c0_3, %c0_4] : memref<1x512xf32, #tpu.memory_space<vmem>>, vector<1x512xf32>
    %5 = vector.broadcast %4 : vector<1x512xf32> to vector<128x512xf32>
    %6 = arith.addf %3, %5 : vector<128x512xf32>
    %cst_5 = arith.constant 0.000000e+00 : f32
    %7 = vector.broadcast %cst_5 : f32 to vector<128x512xf32>
    %8 = arith.maximumf %6, %7 : vector<128x512xf32>
    %9 = arith.truncf %8 : vector<128x512xf32> to vector<128x512xbf16>
    %c0_6 = arith.constant 0 : index
    %c0_7 = arith.constant 0 : index
    %10 = vector.load %arg4[%c0_6, %c0_7] : memref<512x256xbf16, #tpu.memory_space<vmem>>, vector<512x256xbf16>
    %cst_8 = arith.constant dense<0.000000e+00> : vector<128x256xf32>
    %11 = tpu.matmul %9, %10, %cst_8 {dimension_numbers = #tpu.dot_dimension_numbers<[1], [0], [0], [1], [0, 0, 1, 1], [], []>} : vector<128x512xbf16>, vector<512x256xbf16>, vector<128x256xf32> -> vector<128x256xf32>
    %c0_9 = arith.constant 0 : index
    %c0_10 = arith.constant 0 : index
    %12 = vector.load %arg5[%c0_9, %c0_10] : memref<1x256xf32, #tpu.memory_space<vmem>>, vector<1x256xf32>
    %13 = vector.broadcast %12 : vector<1x256xf32> to vector<128x256xf32>
    %14 = arith.addf %11, %13 : vector<128x256xf32>
    %cst_11 = arith.constant 0.000000e+00 : f32
    %15 = vector.broadcast %cst_11 : f32 to vector<128x256xf32>
    %16 = arith.maximumf %14, %15 : vector<128x256xf32>
    %17 = arith.truncf %16 : vector<128x256xf32> to vector<128x256xbf16>
    %c0_12 = arith.constant 0 : index
    %c0_13 = arith.constant 0 : index
    %18 = vector.load %arg6[%c0_12, %c0_13] : memref<256x128xbf16, #tpu.memory_space<vmem>>, vector<256x128xbf16>
    %cst_14 = arith.constant dense<0.000000e+00> : vector<128x128xf32>
    %19 = tpu.matmul %17, %18, %cst_14 {dimension_numbers = #tpu.dot_dimension_numbers<[1], [0], [0], [1], [0, 0, 1, 1], [], []>} : vector<128x256xbf16>, vector<256x128xbf16>, vector<128x128xf32> -> vector<128x128xf32>
    %c0_15 = arith.constant 0 : index
    %c0_16 = arith.constant 0 : index
    %20 = vector.load %arg7[%c0_15, %c0_16] : memref<1x128xf32, #tpu.memory_space<vmem>>, vector<1x128xf32>
    %21 = vector.broadcast %20 : vector<1x128xf32> to vector<128x128xf32>
    %22 = arith.addf %19, %21 : vector<128x128xf32>
    %cst_17 = arith.constant 0.000000e+00 : f32
    %23 = vector.broadcast %cst_17 : f32 to vector<128x128xf32>
    %24 = arith.maximumf %22, %23 : vector<128x128xf32>
    %25 = arith.truncf %24 : vector<128x128xf32> to vector<128x128xbf16>
    %c0_18 = arith.constant 0 : index
    %c0_19 = arith.constant 0 : index
    %26 = vector.load %arg8[%c0_18, %c0_19] : memref<128x128xbf16, #tpu.memory_space<vmem>>, vector<128x128xbf16>
    %cst_20 = arith.constant dense<0.000000e+00> : vector<128x128xf32>
    %27 = tpu.matmul %25, %26, %cst_20 {dimension_numbers = #tpu.dot_dimension_numbers<[1], [0], [0], [1], [0, 0, 1, 1], [], []>} : vector<128x128xbf16>, vector<128x128xbf16>, vector<128x128xf32> -> vector<128x128xf32>
    %c0_21 = arith.constant 0 : index
    %c0_22 = arith.constant 0 : index
    %28 = vector.load %arg9[%c0_21, %c0_22] : memref<1x128xf32, #tpu.memory_space<vmem>>, vector<1x128xf32>
    %29 = vector.broadcast %28 : vector<1x128xf32> to vector<128x128xf32>
    %30 = arith.addf %27, %29 : vector<128x128xf32>
    %c0_23 = arith.constant 0 : index
    %c0_24 = arith.constant 0 : index
    %31 = vector.load %arg10[%c0_23, %c0_24] : memref<128x128xf32, #tpu.memory_space<vmem>>, vector<128x128xf32>
    tpu.vector_store %arg10[%c0_23, %c0_24], %30 {strides = array<i32>} : memref<128x128xf32, #tpu.memory_space<vmem>>, vector<128x128xf32>,
    return
  }
  func.func @transform_0(%arg0: i32) -> (i32, i32) {
    %c0_i32 = arith.constant 0 : i32
    %c0_i32_0 = arith.constant 0 : i32
    return %arg0, %c0_i32 : i32, i32
  }
  func.func @transform_1(%arg0: i32) -> (i32, i32) {
    %c0_i32 = arith.constant 0 : i32
    %c0_i32_0 = arith.constant 0 : i32
    %c0_i32_1 = arith.constant 0 : i32
    return %c0_i32, %c0_i32_0 : i32, i32
  }
  func.func @transform_2(%arg0: i32) -> (i32, i32) {
    %c0_i32 = arith.constant 0 : i32
    %c0_i32_0 = arith.constant 0 : i32
    %c0_i32_1 = arith.constant 0 : i32
    return %c0_i32, %c0_i32_0 : i32, i32
  }
  func.func @transform_3(%arg0: i32) -> (i32, i32) {
    %c0_i32 = arith.constant 0 : i32
    %c0_i32_0 = arith.constant 0 : i32
    %c0_i32_1 = arith.constant 0 : i32
    return %c0_i32, %c0_i32_0 : i32, i32
  }
  func.func @transform_4(%arg0: i32) -> (i32, i32) {
    %c0_i32 = arith.constant 0 : i32
    %c0_i32_0 = arith.constant 0 : i32
    %c0_i32_1 = arith.constant 0 : i32
    return %c0_i32, %c0_i32_0 : i32, i32
  }
  func.func @transform_5(%arg0: i32) -> (i32, i32) {
    %c0_i32 = arith.constant 0 : i32
    %c0_i32_0 = arith.constant 0 : i32
    %c0_i32_1 = arith.constant 0 : i32
    return %c0_i32, %c0_i32_0 : i32, i32
  }
  func.func @transform_6(%arg0: i32) -> (i32, i32) {
    %c0_i32 = arith.constant 0 : i32
    %c0_i32_0 = arith.constant 0 : i32
    %c0_i32_1 = arith.constant 0 : i32
    return %c0_i32, %c0_i32_0 : i32, i32
  }
  func.func @transform_7(%arg0: i32) -> (i32, i32) {
    %c0_i32 = arith.constant 0 : i32
    %c0_i32_0 = arith.constant 0 : i32
    %c0_i32_1 = arith.constant 0 : i32
    return %c0_i32, %c0_i32_0 : i32, i32
  }
  func.func @transform_8(%arg0: i32) -> (i32, i32) {
    %c0_i32 = arith.constant 0 : i32
    %c0_i32_0 = arith.constant 0 : i32
    %c0_i32_1 = arith.constant 0 : i32
    return %c0_i32, %c0_i32_0 : i32, i32
  }
  func.func @transform_9(%arg0: i32) -> (i32, i32) {
    %c0_i32 = arith.constant 0 : i32
    %c0_i32_0 = arith.constant 0 : i32
    return %arg0, %c0_i32 : i32, i32
  }
}

</mosaic_0001>

<bundles_post_ra>
// kernel: tpu_custom_call.1
= control target key start
LH: loop header
LB: loop body
LE: loop exit
PB: predicated region body
PF: predicated region fallthrough
CT: control target
= control target key end

     0   :  { %14 = vsyncpa [#allocation3], 0  ;;  %s6395_s0 = inlined_call_operand.vmem [shape: f32[128,784], index: 0, kind: input, shape index: {}]   ;;  %s6396_s1 = inlined_call_operand.vmem [shape: bf16[784,512], index: 1, kind: input, shape index: {}]   ;;  %s6397_s2 = inlined_call_operand.hbm [shape: f32[1,512], index: 2, kind: input, shape index: {}]   ;;  %s6398_s3 = inlined_call_operand.hbm [shape: bf16[512,256], index: 3, kind: input, shape index: {}]   ;;  %s6399_s4 = inlined_call_operand.vmem [shape: f32[1,256], index: 4, kind: input, shape index: {}]   ;;  %s6400_s5 = inlined_call_operand.vmem [shape: bf16[256,128], index: 5, kind: input, shape index: {}]   ;;  %s6401_s6 = inlined_call_operand.hbm [shape: f32[1,128], index: 6, kind: input, shape index: {}]   ;;  %s6402_s7 = inlined_call_operand.hbm [shape: bf16[128,128], index: 7, kind: input, shape index: {}]   ;;  %s6403_s8 = inlined_call_operand.hbm [shape: f32[1,128], index: 8, kind: input, shape index: {}]   ;;  %s6404_s9 = inlined_call_operand.hbm [shape: f32[128,128], index: 9, kind: output, shape index: {}]  }
   0x1   :  { %15 = vsyncpa [#allocation6], 0 }
   0x2   :  { %16 = vsyncpa [#allocation9], 0 }
   0x3   :  { %17 = vsyncpa [#allocation4], 0  ;;  %s4931_s30 = smov [#allocation5]   ;;  %s4791_s13 = scalar_lea.hbm %s6398_s3, 8192 }
   0x4   :  { %s37_s10 = sshll.u32 %s4931_s30, 4  ;;  %p4792_p0 = scmp.ne.s32.totalorder %s6398_s3, %s4791_s13  ;;  %s38_s10 = int_to_ptr.vmem [resolvable:$true] %s37_s10 }
   0x5   :  { %p4795_p1 = scmp.lt.u32.totalorder %s4791_s13, %s6398_s3 }
   0x7   :  { %p4797_p2 = pnand %p4795_p1, %p4792_p0 }
   0x9   :  { %4800 = shalt.err (!%p4797_p2)
}
   0xa   :  { %s4801_s18 = scalar_lea.vmem %s38_s10, 8192  ;;  %p4806_p4 = scmp.lt.s32.totalorder %s38_s10, %s38_s10 }
   0xb   :  { %p4802_p3 = scmp.ne.s32.totalorder %s38_s10, %s4801_s18  ;;  %p4807_p5 = scmp.lt.s32.totalorder %s4801_s18, %s4801_s18 }
   0xd   :  { %p4808_p6 = por %p4807_p5, %p4806_p4 }
   0xf   :  { %p4809_p7 = pnand %p4808_p6, %p4802_p3 }
  0x11   :  { %4812 = shalt.err (!%p4809_p7)
}
  0x12   :  { %s4932_s19 = smov 128   ;;  %s4933_s20 = smov 8  }
  0x13   :  { %43 = dma.hbm_to_vmem [thread:$0]  %s6398_s3, 8192, %s38_s10, [#allocation6], %s4932_s19, %s4932_s19, %s4933_s20  }
  0x14   :  { %s4934_s23 = smov [#allocation8]   ;;  %s4813_s27 = scalar_lea.hbm %s6402_s7, 1024 }
  0x15   :  { %s63_s24 = sshll.u32 %s4934_s23, 4  ;;  %p4814_p8 = scmp.ne.s32.totalorder %s6402_s7, %s4813_s27  ;;  %s64_s24 = int_to_ptr.vmem [resolvable:$true] %s63_s24 }
  0x16   :  { %p4817_p9 = scmp.lt.u32.totalorder %s4813_s27, %s6402_s7 }
  0x18   :  { %p4819_p10 = pnand %p4817_p9, %p4814_p8 }
  0x1a   :  { %4822 = shalt.err (!%p4819_p10)
}
  0x1b   :  { %s4823_s12 = scalar_lea.vmem %s64_s24, 1024  ;;  %p4828_p12 = scmp.lt.s32.totalorder %s64_s24, %s64_s24 }
  0x1c   :  { %p4824_p11 = scmp.ne.s32.totalorder %s64_s24, %s4823_s12  ;;  %p4829_p13 = scmp.lt.s32.totalorder %s4823_s12, %s4823_s12 }
  0x1e   :  { %p4830_p0 = por %p4829_p13, %p4828_p12 }
  0x20   :  { %p4831_p1 = pnand %p4830_p0, %p4824_p11 }
  0x22   :  { %4834 = shalt.err (!%p4831_p1)
}
  0x23   :  { %s4935_s3 = smov 64   ;;  %s4936_s10 = smov 4  }
  0x24   :  { %69 = dma.hbm_to_vmem [thread:$0]  %s6402_s7, 1024, %s64_s24, [#allocation9], %s4935_s3, %s4935_s3, %s4936_s10  }
  0x25   :  { %s4937_s15 = smov [#allocation2]   ;;  %s4938_s17 = smov [#allocation7]  }
  0x26   :  { %s28_s16 = sshll.u32 %s4937_s15, 4  ;;  %s54_s18 = sshll.u32 %s4938_s17, 4  ;;  %s29_s16 = int_to_ptr.vmem [resolvable:$true] %s28_s16  ;;  %s55_s18 = int_to_ptr.vmem [resolvable:$true] %s54_s18 }
  0x27   :  { %s4835_s23 = scalar_lea.hbm %s6397_s2, 64 }
  0x28   :  { %p4836_p2 = scmp.ne.s32.totalorder %s6397_s2, %s4835_s23  ;;  %p4839_p3 = scmp.lt.u32.totalorder %s4835_s23, %s6397_s2 }
  0x2a   :  { %p4841_p4 = pnand %p4839_p3, %p4836_p2 }
  0x2c   :  { %4844 = shalt.err (!%p4841_p4)
}
  0x2d   :  { %s4845_s7 = scalar_lea.vmem %s29_s16, 64  ;;  %p4850_p6 = scmp.lt.s32.totalorder %s29_s16, %s29_s16 }
  0x2e   :  { %p4846_p5 = scmp.ne.s32.totalorder %s29_s16, %s4845_s7  ;;  %p4851_p7 = scmp.lt.s32.totalorder %s4845_s7, %s4845_s7 }
  0x30   :  { %p4852_p8 = por %p4851_p7, %p4850_p6 }
  0x32   :  { %p4853_p9 = pnand %p4852_p8, %p4846_p5 }
  0x34   :  { %4856 = shalt.err (!%p4853_p9)
}
  0x35   :  { %31 = dma.hbm_to_vmem [thread:$0]  %s6397_s2, 64, %s29_s16, [#allocation3]  }
  0x36   :  { %s4857_s12 = scalar_lea.hbm %s6401_s6, 16 }
  0x37   :  { %p4858_p10 = scmp.ne.s32.totalorder %s6401_s6, %s4857_s12  ;;  %p4861_p11 = scmp.lt.u32.totalorder %s4857_s12, %s6401_s6 }
  0x39   :  { %p4863_p12 = pnand %p4861_p11, %p4858_p10 }
  0x3b   :  { %4866 = shalt.err (!%p4863_p12)
}
  0x3c   :  { %s4867_s15 = scalar_lea.vmem %s55_s18, 16  ;;  %s4871_s17 = scalar_lea.vmem %s55_s18, 32 }
  0x3d   :  { %p4868_p13 = scmp.ne.s32.totalorder %s55_s18, %s4867_s15  ;;  %p4872_p0 = scmp.lt.s32.totalorder %s55_s18, %s55_s18 }
  0x3e   :  { %p4873_p1 = scmp.lt.s32.totalorder %s4871_s17, %s4867_s15 }
  0x40   :  { %p4874_p2 = por %p4873_p1, %p4872_p0 }
  0x42   :  { %p4875_p3 = pnand %p4874_p2, %p4868_p13 }
  0x44   :  { %4878 = shalt.err (!%p4875_p3)
}
  0x45   :  { %57 = dma.hbm_to_vmem [thread:$0]  %s6401_s6, 16, %s55_s18, [#allocation6]  }
  0x46   :  { %s4939_s21 = smov [#allocation10]   ;;  %s4879_s26 = scalar_lea.hbm %s6403_s8, 16 }
  0x47   :  { %s76_s22 = sshll.u32 %s4939_s21, 4  ;;  %p4880_p4 = scmp.ne.s32.totalorder %s6403_s8, %s4879_s26  ;;  %s77_s22 = int_to_ptr.vmem [resolvable:$true] %s76_s22 }
  0x48   :  { %p4883_p5 = scmp.lt.u32.totalorder %s4879_s26, %s6403_s8 }
  0x4a   :  { %p4885_p6 = pnand %p4883_p5, %p4880_p4 }
  0x4c   :  { %4888 = shalt.err (!%p4885_p6)
}
  0x4d   :  { %s4889_s29 = scalar_lea.vmem %s77_s22, 16  ;;  %s4893_s6 = scalar_lea.vmem %s77_s22, 32 }
  0x4e   :  { %p4890_p7 = scmp.ne.s32.totalorder %s77_s22, %s4889_s29  ;;  %p4894_p8 = scmp.lt.s32.totalorder %s77_s22, %s77_s22 }
  0x4f   :  { %p4895_p9 = scmp.lt.s32.totalorder %s4893_s6, %s4889_s29 }
  0x51   :  { %p4896_p10 = por %p4895_p9, %p4894_p8 }
  0x53   :  { %p4897_p11 = pnand %p4896_p10, %p4890_p7 }
  0x55   :  { %4900 = shalt.err (!%p4897_p11)
}
  0x56   :  { %79 = dma.hbm_to_vmem [thread:$0]  %s6403_s8, 16, %s77_s22, [#allocation9]  }
  0x57   :  { %4923 = dma.done.wait [#allocation3], 64  }
  0x58   :  { %4924 = vsyncadd [#allocation3], 4294967232 }
  0x59   :  { %4925 = dma.done.wait [#allocation6], 8208  }
  0x5a   :  { %4926 = vsyncadd [#allocation6], 4294959088 }
  0x5b   :  { %4927 = dma.done.wait [#allocation9], 1040  }
  0x5c   :  { %4928 = vsyncadd [#allocation9], 4294966256  ;;  %v4940_v0 = vmov 0   ;;  %v4377_v1 = vld [vmem:[%s6396_s1 + $0x4] ss:$16 sps:$4 sm:$0xff]   ;;  %v109_v7 = vld [vmem:[%s6395_s0 + $0x68] sm:$0xff] }
  0x5d   :  { %1858 = vmatprep.mubr.bf16.mxu1 %v4940_v0  ;;  %v4379_v2 = vld [vmem:[%s6396_s1 + $0x604] ss:$16 sps:$4 sm:$0xff]   ;;  %1487 = vmatprep.subr.bf16.mxu0 %v4377_v1  ;;  %v4381_v3 = vld [vmem:[%s6396_s1] ss:$16 sps:$4 sm:$0xff]   ;;  %vm1462_vm0 = vcmask 130048   ;;  %v123_v18 = vld [vmem:[%s6395_s0 + $0xd8] sm:$0xff] }
  0x5e   :  { %v4382_v4 = vld [vmem:[%s6396_s1 + $0x600] ss:$16 sps:$4 sm:$0xff]   ;;  %1826 = vmatprep.subr.bf16.mxu1 %v4379_v2  ;;  %v4383_v5 = vld [vmem:[%s6396_s1 + $0x24] ss:$16 sps:$4 sm:$0xff]   ;;  %1488 = vmatpush1.bf16.msra.mxu0 %v4381_v3  ;;  %v4385_v9 = vld [vmem:[%s6396_s1 + $0x8] ss:$16 sps:$4 sm:$0xff]  }
  0x5f   :  { %v102_v6 = vld [vmem:[%s6395_s0 + $0x30] sm:$0xff]  ;;  %1827 = vmatpush1.bf16.msra.mxu1 %v4382_v4  ;;  %1489 = vmatprep.subr.bf16.mxu0 %v4383_v5  ;;  %v4387_v10 = vld [vmem:[%s6396_s1 + $0xc] ss:$16 sps:$4 sm:$0xff]   ;;  %v4391_v13 = vld [vmem:[%s6396_s1 + $0x28] ss:$16 sps:$4 sm:$0xff]  }
  0x60   :  { %v5077_v8 = vpack.c.bf16 %v109_v7, %v102_v6  ;;  %v4388_v11 = vld [vmem:[%s6396_s1 + $0x20] ss:$16 sps:$4 sm:$0xff]   ;;  %v4389_v12 = vld [vmem:[%s6396_s1 + $0x44] ss:$16 sps:$4 sm:$0xff]   ;;  %1939 = vmatprep.subr.bf16.mxu1 %v4387_v10  ;;  %v4393_v14 = vld [vmem:[%s6396_s1 + $0x2c] ss:$16 sps:$4 sm:$0xff]  }
  0x61   :  { %v4394_v15 = vld [vmem:[%s6396_s1 + $0x40] ss:$16 sps:$4 sm:$0xff]   ;;  %v4395_v16 = vld [vmem:[%s6396_s1 + $0x64] ss:$16 sps:$4 sm:$0xff]   ;;  %v4397_v20 = vld [vmem:[%s6396_s1 + $0x48] ss:$16 sps:$4 sm:$0xff]  }
  0x62   :  { %3812 = vmatmul.mubr.msk.bf16.vlgmr.msra.gmra.mrb[0].mxu1 %vm1462_vm0, %v5077_v8  ;;  %1490 = vmatpush1.bf16.msra.mxu0 %v4388_v11  ;;  %v116_v17 = vld [vmem:[%s6395_s0 + $0xa0] sm:$0xff]  ;;  %v4399_v21 = vld [vmem:[%s6396_s1 + $0x4c] ss:$16 sps:$4 sm:$0xff]   ;;  %v4403_v24 = vld [vmem:[%s6396_s1 + $0x68] ss:$16 sps:$4 sm:$0xff]  }
  0x63   :  { %1940 = vmatpush1.bf16.msra.mxu1 %v4385_v9  ;;  %1491 = vmatprep.subr.bf16.mxu0 %v4389_v12  ;;  %v5112_v19 = vpack.c.bf16 %v123_v18, %v116_v17  ;;  %v4400_v22 = vld [vmem:[%s6396_s1 + $0x60] ss:$16 sps:$4 sm:$0xff]   ;;  %v4401_v23 = vld [vmem:[%s6396_s1 + $0x84] ss:$16 sps:$4 sm:$0xff]   ;;  %v4405_v25 = vld [vmem:[%s6396_s1 + $0x6c] ss:$16 sps:$4 sm:$0xff]  }
  0x64   :  { %1868 = vmatprep.mubr.bf16.mxu1 %v4940_v0  ;;  %1941 = vmatprep.subr.bf16.mxu1 %v4393_v14  ;;  %v4406_v26 = vld [vmem:[%s6396_s1 + $0x80] ss:$16 sps:$4 sm:$0xff]   ;;  %v137_v28 = vld [vmem:[%s6395_s0 + $0x148] sm:$0xff]  ;;  %v4407_v29 = vld [vmem:[%s6396_s1 + $0xa4] ss:$16 sps:$4 sm:$0xff]  }
  0x65   :  { %v130_v27 = vld [vmem:[%s6395_s0 + $0x110] sm:$0xff]  ;;  %v4411_v30 = vld [vmem:[%s6396_s1 + $0x8c] ss:$16 sps:$4 sm:$0xff]   ;;  %v4409_v32 = vld [vmem:[%s6396_s1 + $0x88] ss:$16 sps:$4 sm:$0xff]  }
  0x66   :  { %1492 = vmatpush1.bf16.msra.mxu0 %v4394_v15  ;;  %v5150_v31 = vpack.c.bf16 %v137_v28, %v130_v27  ;;  %v4412_v33 = vld [vmem:[%s6396_s1 + $0xa0] ss:$16 sps:$4 sm:$0xff]   ;;  %v4413_v34 = vld [vmem:[%s6396_s1 + $0xc4] ss:$16 sps:$4 sm:$0xff]   ;;  %v4417_v35 = vld [vmem:[%s6396_s1 + $0xac] ss:$16 sps:$4 sm:$0xff]  }
  0x67   :  { %1942 = vmatpush1.bf16.msra.mxu1 %v4391_v13  ;;  %1493 = vmatprep.subr.bf16.mxu0 %v4395_v16  ;;  %v4415_v36 = vld [vmem:[%s6396_s1 + $0xa8] ss:$16 sps:$4 sm:$0xff]   ;;  %v4418_v37 = vld [vmem:[%s6396_s1 + $0xc0] ss:$16 sps:$4 sm:$0xff]   ;;  %v4419_v38 = vld [vmem:[%s6396_s1 + $0xe4] ss:$16 sps:$4 sm:$0xff]  }
  0x68   :  { %1943 = vmatprep.subr.bf16.mxu1 %v4399_v21  ;;  %v144_v39 = vld [vmem:[%s6395_s0 + $0x180] sm:$0xff]  ;;  %v151_v40 = vld [vmem:[%s6395_s0 + $0x1b8] sm:$0xff]  ;;  %v158_v49 = vld [vmem:[%s6395_s0 + $0x1f0] sm:$0xff] }
  0x69   :  { %v4423_v41 = vld [vmem:[%s6396_s1 + $0xcc] ss:$16 sps:$4 sm:$0xff]   ;;  %v5185_v42 = vpack.c.bf16 %v151_v40, %v144_v39  ;;  %v4421_v43 = vld [vmem:[%s6396_s1 + $0xc8] ss:$16 sps:$4 sm:$0xff]   ;;  %v4424_v44 = vld [vmem:[%s6396_s1 + $0xe0] ss:$16 sps:$4 sm:$0xff]  }
  0x6a   :  { %3813 = vmatmul.mubr.msk.bf16.gmra.mrb[4].mxu1 %vm1462_vm0, %v5112_v19  ;;  %1494 = vmatpush1.bf16.msra.mxu0 %v4400_v22  ;;  %v4425_v45 = vld [vmem:[%s6396_s1 + $0x104] ss:$16 sps:$4 sm:$0xff]   ;;  %v4429_v46 = vld [vmem:[%s6396_s1 + $0xec] ss:$16 sps:$4 sm:$0xff]   ;;  %v4427_v47 = vld [vmem:[%s6396_s1 + $0xe8] ss:$16 sps:$4 sm:$0xff]  }
  0x6b   :  { %1944 = vmatpush1.bf16.msra.mxu1 %v4397_v20  ;;  %1495 = vmatprep.subr.bf16.mxu0 %v4401_v23  ;;  %v4430_v48 = vld [vmem:[%s6396_s1 + $0x100] ss:$16 sps:$4 sm:$0xff]   ;;  %v165_v50 = vld [vmem:[%s6395_s0 + $0x228] sm:$0xff]  ;;  %v4431_v51 = vld [vmem:[%s6396_s1 + $0x124] ss:$16 sps:$4 sm:$0xff]  }
  0x6c   :  { %1945 = vmatprep.subr.bf16.mxu1 %v4405_v25  ;;  %1878 = vmatprep.mubr.bf16.mxu1 %v4940_v0  ;;  %v4435_v52 = vld [vmem:[%s6396_s1 + $0x10c] ss:$16 sps:$4 sm:$0xff]   ;;  %v5220_v53 = vpack.c.bf16 %v165_v50, %v158_v49  ;;  %v4433_v54 = vld [vmem:[%s6396_s1 + $0x108] ss:$16 sps:$4 sm:$0xff]   ;;  %v4436_v55 = vld [vmem:[%s6396_s1 + $0x120] ss:$16 sps:$4 sm:$0xff]  }
  0x6d   :  { %v4437_v56 = vld [vmem:[%s6396_s1 + $0x144] ss:$16 sps:$4 sm:$0xff]   ;;  %v4441_v57 = vld [vmem:[%s6396_s1 + $0x12c] ss:$16 sps:$4 sm:$0xff]   ;;  %v4439_v58 = vld [vmem:[%s6396_s1 + $0x128] ss:$16 sps:$4 sm:$0xff]  }
  0x6e   :  { %1496 = vmatpush1.bf16.msra.mxu0 %v4406_v26  ;;  %v4442_v59 = vld [vmem:[%s6396_s1 + $0x140] ss:$16 sps:$4 sm:$0xff]   ;;  %v179_v61 = vld [vmem:[%s6395_s0 + $0x298] sm:$0xff]  ;;  %v4443_v62 = vld [vmem:[%s6396_s1 + $0x164] ss:$16 sps:$4 sm:$0xff]  }
  0x6f   :  { %1946 = vmatpush1.bf16.msra.mxu1 %v4403_v24  ;;  %1497 = vmatprep.subr.bf16.mxu0 %v4407_v29  ;;  %v172_v60 = vld [vmem:[%s6395_s0 + $0x260] sm:$0xff]  ;;  %v4447_v63 = vld [vmem:[%s6396_s1 + $0x14c] ss:$16 sps:$4 sm:$0xff]   ;;  %v4445_v2 = vld [vmem:[%s6396_s1 + $0x148] ss:$16 sps:$4 sm:$0xff]  }
  0x70   :  { %1947 = vmatprep.subr.bf16.mxu1 %v4411_v30  ;;  %v5255_v1 = vpack.c.bf16 %v179_v61, %v172_v60  ;;  %v4448_v3 = vld [vmem:[%s6396_s1 + $0x160] ss:$16 sps:$4 sm:$0xff]   ;;  %v4449_v4 = vld [vmem:[%s6396_s1 + $0x184] ss:$16 sps:$4 sm:$0xff]   ;;  %v4453_v5 = vld [vmem:[%s6396_s1 + $0x16c] ss:$16 sps:$4 sm:$0xff]  }
  0x71   :  { %v4451_v6 = vld [vmem:[%s6396_s1 + $0x168] ss:$16 sps:$4 sm:$0xff]   ;;  %v4454_v7 = vld [vmem:[%s6396_s1 + $0x180] ss:$16 sps:$4 sm:$0xff]   ;;  %v4455_v9 = vld [vmem:[%s6396_s1 + $0x1a4] ss:$16 sps:$4 sm:$0xff]  }
  0x72   :  { %3814 = vmatmul.mubr.msk.bf16.gmra.mrb[8].mxu1 %vm1462_vm0, %v5150_v31  ;;  %1498 = vmatpush1.bf16.msra.mxu0 %v4412_v33  ;;  %v186_v10 = vld [vmem:[%s6395_s0 + $0x2d0] sm:$0xff]  ;;  %v193_v11 = vld [vmem:[%s6395_s0 + $0x308] sm:$0xff]  ;;  %v104_v13 = vld [vmem:[%s6395_s0 + $0x40] sm:$0xff] }
  0x73   :  { %1948 = vmatpush1.bf16.msra.mxu1 %v4409_v32  ;;  %1499 = vmatprep.subr.bf16.mxu0 %v4413_v34  ;;  %v97_v12 = vld [vmem:[%s6395_s0 + $0x8] sm:$0xff]  ;;  %v5296_v16 = vpack.c.bf16 %v193_v11, %v186_v10  ;;  %v4460_v18 = vld [vmem:[%s6396_s1 + $0x1a0] ss:$16 sps:$4 sm:$0xff]   ;;  %v4461_v20 = vld [vmem:[%s6396_s1 + $0x1c4] ss:$16 sps:$4 sm:$0xff]  }
  0x74   :  { %1949 = vmatprep.subr.bf16.mxu1 %v4417_v35  ;;  %1888 = vmatprep.mubr.bf16.mxu1 %v4940_v0  ;;  %v4459_v14 = vld [vmem:[%s6396_s1 + $0x18c] ss:$16 sps:$4 sm:$0xff]   ;;  %v209_v15 = vpack.c.bf16 %v104_v13, %v97_v12  ;;  %v4457_v17 = vld [vmem:[%s6396_s1 + $0x188] ss:$16 sps:$4 sm:$0xff]   ;;  %v4466_v23 = vld [vmem:[%s6396_s1 + $0x1c0] ss:$16 sps:$4 sm:$0xff]  }
  0x75   :  { %v4465_v21 = vld [vmem:[%s6396_s1 + $0x1ac] ss:$16 sps:$4 sm:$0xff]   ;;  %v4463_v22 = vld [vmem:[%s6396_s1 + $0x1a8] ss:$16 sps:$4 sm:$0xff]   ;;  %v4467_v24 = vld [vmem:[%s6396_s1 + $0x1e4] ss:$16 sps:$4 sm:$0xff]  }
  0x76   :  { %1500 = vmatpush1.bf16.msra.mxu0 %v4418_v37  ;;  %1519 = vmatprep.mubr.bf16.mxu0 %v209_v15  ;;  %v200_v25 = vld [vmem:[%s6395_s0 + $0x340] sm:$0xff]  ;;  %v207_v26 = vld [vmem:[%s6395_s0 + $0x378] sm:$0xff]  ;;  %v118_v40 = vld [vmem:[%s6395_s0 + $0xb0] sm:$0xff] }
  0x77   :  { %1950 = vmatpush1.bf16.msra.mxu1 %v4415_v36  ;;  %1501 = vmatprep.subr.bf16.mxu0 %v4419_v38  ;;  %v4471_v27 = vld [vmem:[%s6396_s1 + $0x1cc] ss:$16 sps:$4 sm:$0xff]   ;;  %v4469_v28 = vld [vmem:[%s6396_s1 + $0x1c8] ss:$16 sps:$4 sm:$0xff]   ;;  %v5334_v29 = vpack.c.bf16 %v207_v26, %v200_v25  ;;  %v4472_v30 = vld [vmem:[%s6396_s1 + $0x1e0] ss:$16 sps:$4 sm:$0xff]  }
  0x78   :  { %1951 = vmatprep.subr.bf16.mxu1 %v4423_v41  ;;  %v96_v32 = vld [vmem:[%s6395_s0] sm:$0xff]  ;;  %v103_v33 = vld [vmem:[%s6395_s0 + $0x38] sm:$0xff] }
  0x79   :  { %v4475_v34 = vld [vmem:[%s6396_s1 + $0x204] ss:$16 sps:$4 sm:$0xff]   ;;  %v4478_v35 = vld [vmem:[%s6396_s1 + $0x1ec] ss:$16 sps:$4 sm:$0xff]   ;;  %v4473_v36 = vld [vmem:[%s6396_s1 + $0x200] ss:$16 sps:$4 sm:$0xff]   ;;  %v208_v38 = vpack.c.bf16 %v103_v33, %v96_v32 }
  0x7a   :  { %3815 = vmatmul.mubr.msk.bf16.gmra.mrb[12].mxu1 %vm1462_vm0, %v5185_v42  ;;  %1502 = vmatpush1.bf16.msra.mxu0 %v4424_v44  ;;  %v4476_v37 = vld [vmem:[%s6396_s1 + $0x1e8] ss:$16 sps:$4 sm:$0xff]   ;;  %v4481_v41 = vld [vmem:[%s6396_s1 + $0x224] ss:$16 sps:$4 sm:$0xff]   ;;  %v4490_v50 = vld [vmem:[%s6396_s1 + $0x22c] ss:$16 sps:$4 sm:$0xff]  }
  0x7b   :  { %1952 = vmatpush1.bf16.msra.mxu1 %v4421_v43  ;;  %1503 = vmatprep.subr.bf16.mxu0 %v4425_v45  ;;  %v111_v39 = vld [vmem:[%s6395_s0 + $0x78] sm:$0xff]  ;;  %v4479_v45 = vld [vmem:[%s6396_s1 + $0x220] ss:$16 sps:$4 sm:$0xff]   ;;  %v4487_v49 = vld [vmem:[%s6396_s1 + $0x244] ss:$16 sps:$4 sm:$0xff]  }
  0x7c   :  { %1953 = vmatprep.subr.bf16.mxu1 %v4429_v46  ;;  %1898 = vmatprep.mubr.bf16.mxu1 %v4940_v0  ;;  %v4484_v43 = vld [vmem:[%s6396_s1 + $0x20c] ss:$16 sps:$4 sm:$0xff]   ;;  %v216_v44 = vpack.c.bf16 %v118_v40, %v111_v39  ;;  %v4482_v46 = vld [vmem:[%s6396_s1 + $0x208] ss:$16 sps:$4 sm:$0xff]   ;;  %v4505_v10 = vld [vmem:[%s6396_s1 + $0x2a4] ss:$16 sps:$4 sm:$0xff]  }
  0x7d   :  { %v4494_v61 = vld [vmem:[%s6396_s1 + $0x248] ss:$16 sps:$4 sm:$0xff]   ;;  %v4508_v11 = vld [vmem:[%s6396_s1 + $0x28c] ss:$16 sps:$4 sm:$0xff]   ;;  %v4503_v12 = vld [vmem:[%s6396_s1 + $0x2a0] ss:$16 sps:$4 sm:$0xff]  }
  0x7e   :  { %1504 = vmatpush1.bf16.msra.mxu0 %v4430_v48  ;;  %v117_v48 = vld [vmem:[%s6395_s0 + $0xa8] sm:$0xff]  ;;  %v4517_v26 = vld [vmem:[%s6396_s1 + $0x2e4] ss:$16 sps:$4 sm:$0xff]   ;;  %v167_v40 = vld [vmem:[%s6395_s0 + $0x238] sm:$0xff] }
  0x7f   :  { %1954 = vmatpush1.bf16.msra.mxu1 %v4427_v47  ;;  %1505 = vmatprep.subr.bf16.mxu0 %v4431_v51  ;;  %v110_v47 = vld [vmem:[%s6395_s0 + $0x70] sm:$0xff]  ;;  %v4506_v13 = vld [vmem:[%s6396_s1 + $0x288] ss:$16 sps:$4 sm:$0xff]   ;;  %v152_v33 = vld [vmem:[%s6395_s0 + $0x1c0] sm:$0xff] }
  0x80   :  { %1955 = vmatprep.subr.bf16.mxu1 %v4435_v52  ;;  %v4485_v51 = vld [vmem:[%s6396_s1 + $0x240] ss:$16 sps:$4 sm:$0xff]   ;;  %v4488_v52 = vld [vmem:[%s6396_s1 + $0x228] ss:$16 sps:$4 sm:$0xff]  }
  0x81   :  { %v4512_v25 = vld [vmem:[%s6396_s1 + $0x2a8] ss:$16 sps:$4 sm:$0xff]  }
  0x82   :  { %3816 = vmatmul.mubr.msk.bf16.gmra.mrb[16].mxu1 %vm1462_vm0, %v5220_v53  ;;  %1506 = vmatpush1.bf16.msra.mxu0 %v4436_v55  ;;  %v125_v55 = vld [vmem:[%s6395_s0 + $0xe8] sm:$0xff] }
  0x83   :  { %1956 = vmatpush1.bf16.msra.mxu1 %v4433_v54  ;;  %1507 = vmatprep.subr.bf16.mxu0 %v4437_v56  ;;  %v215_v54 = vpack.c.bf16 %v117_v48, %v110_v47  ;;  %v132_v56 = vld [vmem:[%s6395_s0 + $0x120] sm:$0xff]  ;;  %v4524_v39 = vld [vmem:[%s6396_s1 + $0x2e8] ss:$16 sps:$4 sm:$0xff]   ;;  %v166_v48 = vld [vmem:[%s6395_s0 + $0x230] sm:$0xff] }
  0x84   :  { %1957 = vmatprep.subr.bf16.mxu1 %v4441_v57  ;;  %1908 = vmatprep.mubr.bf16.mxu1 %v4940_v0  ;;  %v4493_v57 = vld [vmem:[%s6396_s1 + $0x264] ss:$16 sps:$4 sm:$0xff]   ;;  %v223_v60 = vpack.c.bf16 %v132_v56, %v125_v55  ;;  %v4530_v47 = vld [vmem:[%s6396_s1 + $0x308] ss:$16 sps:$4 sm:$0xff]  }
  0x85   :  { %v181_v56 = vld [vmem:[%s6395_s0 + $0x2a8] sm:$0xff] }
  0x86   :  { %1508 = vmatpush1.bf16.msra.mxu0 %v4442_v59  ;;  %v4491_v59 = vld [vmem:[%s6396_s1 + $0x260] ss:$16 sps:$4 sm:$0xff]  }
  0x87   :  { %1958 = vmatpush1.bf16.msra.mxu1 %v4439_v58  ;;  %1509 = vmatprep.subr.bf16.mxu0 %v4443_v62  ;;  %v4496_v58 = vld [vmem:[%s6396_s1 + $0x24c] ss:$16 sps:$4 sm:$0xff]   ;;  %v124_v62 = vld [vmem:[%s6395_s0 + $0xe0] sm:$0xff] }
  0x88   :  { %1959 = vmatprep.subr.bf16.mxu1 %v4447_v63  ;;  %v131_v63 = vld [vmem:[%s6395_s0 + $0x118] sm:$0xff] }
  0x8a   :  { %3817 = vmatmul.mubr.msk.bf16.gmra.mrb[20].mxu1 %vm1462_vm0, %v5255_v1  ;;  %1510 = vmatpush1.bf16.msra.mxu0 %v4448_v3  ;;  %v4502_v3 = vld [vmem:[%s6396_s1 + $0x26c] ss:$16 sps:$4 sm:$0xff]  }
  0x8b   :  { %1960 = vmatpush1.bf16.msra.mxu1 %v4445_v2  ;;  %1511 = vmatprep.subr.bf16.mxu0 %v4449_v4  ;;  %v4499_v2 = vld [vmem:[%s6396_s1 + $0x284] ss:$16 sps:$4 sm:$0xff]   ;;  %v4497_v4 = vld [vmem:[%s6396_s1 + $0x280] ss:$16 sps:$4 sm:$0xff]  }
  0x8c   :  { %1961 = vmatprep.subr.bf16.mxu1 %v4453_v5  ;;  %1918 = vmatprep.mubr.bf16.mxu1 %v4940_v0  ;;  %v222_v5 = vpack.c.bf16 %v131_v63, %v124_v62  ;;  %v4542_v62 = vld [vmem:[%s6396_s1 + $0x348] ss:$16 sps:$4 sm:$0xff]   ;;  %v180_v63 = vld [vmem:[%s6395_s0 + $0x2a0] sm:$0xff] }
  0x8e   :  { %1512 = vmatpush1.bf16.msra.mxu0 %v4454_v7  ;;  %v146_v7 = vld [vmem:[%s6395_s0 + $0x190] sm:$0xff] }
  0x8f   :  { %1962 = vmatpush1.bf16.msra.mxu1 %v4451_v6  ;;  %1513 = vmatprep.subr.bf16.mxu0 %v4455_v9  ;;  %v139_v6 = vld [vmem:[%s6395_s0 + $0x158] sm:$0xff] }
  0x90   :  { %1963 = vmatprep.subr.bf16.mxu1 %v4459_v14  ;;  %v4500_v9 = vld [vmem:[%s6396_s1 + $0x268] ss:$16 sps:$4 sm:$0xff]   ;;  %v230_v14 = vpack.c.bf16 %v146_v7, %v139_v6 }
  0x91   :  { %v4548_v6 = vld [vmem:[%s6396_s1 + $0x368] ss:$16 sps:$4 sm:$0xff]  }
  0x92   :  { %3818 = vmatmul.mubr.msk.bf16.gmra.mrb[24].mxu1 %vm1462_vm0, %v5296_v16  ;;  %1514 = vmatpush1.bf16.msra.mxu0 %v4460_v18  ;;  %v4511_v18 = vld [vmem:[%s6396_s1 + $0x2c4] ss:$16 sps:$4 sm:$0xff]  }
  0x93   :  { %1964 = vmatpush1.bf16.msra.mxu1 %v4457_v17  ;;  %1515 = vmatprep.subr.bf16.mxu0 %v4461_v20  ;;  %v145_v17 = vld [vmem:[%s6395_s0 + $0x188] sm:$0xff] }
  0x94   :  { %1965 = vmatprep.subr.bf16.mxu1 %v4465_v21  ;;  %1928 = vmatprep.mubr.bf16.mxu1 %v4940_v0  ;;  %v4514_v20 = vld [vmem:[%s6396_s1 + $0x2ac] ss:$16 sps:$4 sm:$0xff]  }
  0x96   :  { %1516 = vmatpush1.bf16.msra.mxu0 %v4466_v23  ;;  %v160_v23 = vld [vmem:[%s6395_s0 + $0x200] sm:$0xff] }
  0x97   :  { %1966 = vmatpush1.bf16.msra.mxu1 %v4463_v22  ;;  %1517 = vmatprep.subr.bf16.mxu0 %v4467_v24  ;;  %v153_v22 = vld [vmem:[%s6395_s0 + $0x1c8] sm:$0xff]  ;;  %v4509_v24 = vld [vmem:[%s6396_s1 + $0x2c0] ss:$16 sps:$4 sm:$0xff]  }
  0x98   :  { %1967 = vmatprep.subr.bf16.mxu1 %v4471_v27  ;;  %v4520_v27 = vld [vmem:[%s6396_s1 + $0x2cc] ss:$16 sps:$4 sm:$0xff]   ;;  %v237_v32 = vpack.c.bf16 %v160_v23, %v153_v22  ;;  %v4557_v22 = vld [vmem:[%s6396_s1 + $0x3c0] ss:$16 sps:$4 sm:$0xff]  }
  0x9a   :  { %3819 = vmatmul.mubr.msk.bf16.gmra.mrb[28].mxu1 %vm1462_vm0, %v5334_v29  ;;  %1518 = vmatpush1.bf16.msra.mxu0 %v4472_v30  ;;  %v4518_v30 = vld [vmem:[%s6396_s1 + $0x2c8] ss:$16 sps:$4 sm:$0xff]  }
  0x9b   :  { %1968 = vmatpush1.bf16.msra.mxu1 %v4469_v28  ;;  %1600 = vmatprep.subr.bf16.mxu0 %v4475_v34  ;;  %v4515_v28 = vld [vmem:[%s6396_s1 + $0x2e0] ss:$16 sps:$4 sm:$0xff]   ;;  %v159_v34 = vld [vmem:[%s6395_s0 + $0x1f8] sm:$0xff] }
  0x9c   :  { %1969 = vmatprep.subr.bf16.mxu1 %v4478_v35  ;;  %1971 = vmatprep.mubr.bf16.mxu1 %v209_v15  ;;  %v138_v15 = vld [vmem:[%s6395_s0 + $0x150] sm:$0xff] }
  0x9d   :  { %1520 = vmatmul.mubr.bf16.vlgmr.msra.gmra.mrb[0].mxu0 %v208_v38  ;;  %v229_v21 = vpack.c.bf16 %v145_v17, %v138_v15  ;;  %v4523_v35 = vld [vmem:[%s6396_s1 + $0x304] ss:$16 sps:$4 sm:$0xff]   ;;  %v4554_v15 = vld [vmem:[%s6396_s1 + $0x388] ss:$16 sps:$4 sm:$0xff]  }
  0x9e   :  { %1601 = vmatpush1.bf16.msra.mxu0 %v4473_v36  ;;  %1529 = vmatprep.mubr.bf16.mxu0 %v216_v44  ;;  %v4526_v36 = vld [vmem:[%s6396_s1 + $0x2ec] ss:$16 sps:$4 sm:$0xff]   ;;  %v194_v17 = vld [vmem:[%s6395_s0 + $0x310] sm:$0xff] }
  0x9f   :  { %1970 = vmatpush1.bf16.msra.mxu1 %v4476_v37  ;;  %1602 = vmatprep.subr.bf16.mxu0 %v4481_v41  ;;  %v4521_v37 = vld [vmem:[%s6396_s1 + $0x300] ss:$16 sps:$4 sm:$0xff]  }
  0xa0   :  { %2052 = vmatprep.subr.bf16.mxu1 %v4484_v43  ;;  %v174_v41 = vld [vmem:[%s6395_s0 + $0x270] sm:$0xff] }
  0xa1   :  { %v4529_v43 = vld [vmem:[%s6396_s1 + $0x324] ss:$16 sps:$4 sm:$0xff]  }
  0xa2   :  { %1972 = vmatmul.mubr.bf16.vlgmr.msra.gmra.mrb[32].mxu1 %v208_v38  ;;  %1603 = vmatpush1.bf16.msra.mxu0 %v4479_v45  ;;  %v236_v38 = vpack.c.bf16 %v159_v34, %v152_v33  ;;  %v4527_v45 = vld [vmem:[%s6396_s1 + $0x320] ss:$16 sps:$4 sm:$0xff]  }
  0xa3   :  { %2053 = vmatpush1.bf16.msra.mxu1 %v4482_v46  ;;  %1604 = vmatprep.subr.bf16.mxu0 %v4487_v49  ;;  %v244_v46 = vpack.c.bf16 %v174_v41, %v167_v40  ;;  %v173_v49 = vld [vmem:[%s6395_s0 + $0x268] sm:$0xff]  ;;  %v98_v34 = vld [vmem:[%s6395_s0 + $0x10] sm:$0xff]  ;;  %v120_v40 = vld [vmem:[%s6395_s0 + $0xc0] sm:$0xff] }
  0xa4   :  { %2054 = vmatprep.subr.bf16.mxu1 %v4490_v50  ;;  %1981 = vmatprep.mubr.bf16.mxu1 %v216_v44  ;;  %v4532_v44 = vld [vmem:[%s6396_s1 + $0x30c] ss:$16 sps:$4 sm:$0xff]   ;;  %v4535_v50 = vld [vmem:[%s6396_s1 + $0x344] ss:$16 sps:$4 sm:$0xff]   ;;  %v243_v55 = vpack.c.bf16 %v173_v49, %v166_v48  ;;  %v4569_v41 = vld [vmem:[%s6396_s1 + $0x400] ss:$16 sps:$4 sm:$0xff]  }
  0xa5   :  { %1530 = vmatmul.mubr.bf16.gmra.mrb[4].mxu0 %v215_v54  ;;  %v112_v49 = vld [vmem:[%s6395_s0 + $0x80] sm:$0xff] }
  0xa6   :  { %1605 = vmatpush1.bf16.msra.mxu0 %v4485_v51  ;;  %1539 = vmatprep.mubr.bf16.mxu0 %v223_v60  ;;  %v4538_v51 = vld [vmem:[%s6396_s1 + $0x32c] ss:$16 sps:$4 sm:$0xff]  }
  0xa7   :  { %2055 = vmatpush1.bf16.msra.mxu1 %v4488_v52  ;;  %1606 = vmatprep.subr.bf16.mxu0 %v4493_v57  ;;  %v4533_v52 = vld [vmem:[%s6396_s1 + $0x340] ss:$16 sps:$4 sm:$0xff]  }
  0xa8   :  { %2056 = vmatprep.subr.bf16.mxu1 %v4496_v58  ;;  %v188_v57 = vld [vmem:[%s6395_s0 + $0x2e0] sm:$0xff] }
  0xa9   :  { %v4541_v58 = vld [vmem:[%s6396_s1 + $0x364] ss:$16 sps:$4 sm:$0xff]  }
  0xaa   :  { %1982 = vmatmul.mubr.bf16.gmra.mrb[36].mxu1 %v215_v54  ;;  %1607 = vmatpush1.bf16.msra.mxu0 %v4491_v59  ;;  %v4536_v54 = vld [vmem:[%s6396_s1 + $0x328] ss:$16 sps:$4 sm:$0xff]   ;;  %v4544_v59 = vld [vmem:[%s6396_s1 + $0x34c] ss:$16 sps:$4 sm:$0xff]  }
  0xab   :  { %2057 = vmatpush1.bf16.msra.mxu1 %v4494_v61  ;;  %1608 = vmatprep.subr.bf16.mxu0 %v4499_v2  ;;  %v4539_v61 = vld [vmem:[%s6396_s1 + $0x360] ss:$16 sps:$4 sm:$0xff]   ;;  %v187_v2 = vld [vmem:[%s6395_s0 + $0x2d8] sm:$0xff] }
  0xac   :  { %2058 = vmatprep.subr.bf16.mxu1 %v4502_v3  ;;  %1991 = vmatprep.mubr.bf16.mxu1 %v223_v60  ;;  %v251_v60 = vpack.c.bf16 %v188_v57, %v181_v56  ;;  %v4547_v3 = vld [vmem:[%s6396_s1 + $0x384] ss:$16 sps:$4 sm:$0xff]   ;;  %v250_v7 = vpack.c.bf16 %v187_v2, %v180_v63  ;;  %v4584_v56 = vld [vmem:[%s6396_s1 + $0x428] ss:$16 sps:$4 sm:$0xff]  }
  0xad   :  { %1540 = vmatmul.mubr.bf16.gmra.mrb[8].mxu0 %v222_v5  ;;  %v127_v57 = vld [vmem:[%s6395_s0 + $0xf8] sm:$0xff]  ;;  %v126_v2 = vld [vmem:[%s6395_s0 + $0xf0] sm:$0xff] }
  0xae   :  { %1609 = vmatpush1.bf16.msra.mxu0 %v4497_v4  ;;  %1549 = vmatprep.mubr.bf16.mxu0 %v230_v14  ;;  %v4550_v4 = vld [vmem:[%s6396_s1 + $0x36c] ss:$16 sps:$4 sm:$0xff]   ;;  %v4590_v63 = vld [vmem:[%s6396_s1 + $0x448] ss:$16 sps:$4 sm:$0xff]  }
  0xaf   :  { %2059 = vmatpush1.bf16.msra.mxu1 %v4500_v9  ;;  %1610 = vmatprep.subr.bf16.mxu0 %v4505_v10  ;;  %v195_v9 = vld [vmem:[%s6395_s0 + $0x318] sm:$0xff]  ;;  %v202_v10 = vld [vmem:[%s6395_s0 + $0x350] sm:$0xff] }
  0xb0   :  { %2060 = vmatprep.subr.bf16.mxu1 %v4508_v11  ;;  %v4553_v11 = vld [vmem:[%s6396_s1 + $0x3a4] ss:$16 sps:$4 sm:$0xff]  }
  0xb2   :  { %1992 = vmatmul.mubr.bf16.gmra.mrb[40].mxu1 %v222_v5  ;;  %1611 = vmatpush1.bf16.msra.mxu0 %v4503_v12  ;;  %v4545_v5 = vld [vmem:[%s6396_s1 + $0x380] ss:$16 sps:$4 sm:$0xff]   ;;  %v4556_v12 = vld [vmem:[%s6396_s1 + $0x38c] ss:$16 sps:$4 sm:$0xff]  }
  0xb3   :  { %2061 = vmatpush1.bf16.msra.mxu1 %v4506_v13  ;;  %1612 = vmatprep.subr.bf16.mxu0 %v4511_v18  ;;  %v4551_v13 = vld [vmem:[%s6396_s1 + $0x3a0] ss:$16 sps:$4 sm:$0xff]   ;;  %v201_v18 = vld [vmem:[%s6395_s0 + $0x348] sm:$0xff] }
  0xb4   :  { %2062 = vmatprep.subr.bf16.mxu1 %v4514_v20  ;;  %2001 = vmatprep.mubr.bf16.mxu1 %v230_v14  ;;  %v258_v14 = vpack.c.bf16 %v202_v10, %v195_v9  ;;  %v4559_v20 = vld [vmem:[%s6396_s1 + $0x3c4] ss:$16 sps:$4 sm:$0xff]   ;;  %v257_v23 = vpack.c.bf16 %v201_v18, %v194_v17  ;;  %v141_v10 = vld [vmem:[%s6395_s0 + $0x168] sm:$0xff] }
  0xb5   :  { %1550 = vmatmul.mubr.bf16.gmra.mrb[12].mxu0 %v229_v21  ;;  %v4602_v17 = vld [vmem:[%s6396_s1 + $0x488] ss:$16 sps:$4 sm:$0xff]   ;;  %v140_v18 = vld [vmem:[%s6395_s0 + $0x160] sm:$0xff] }
  0xb6   :  { %1613 = vmatpush1.bf16.msra.mxu0 %v4509_v24  ;;  %1559 = vmatprep.mubr.bf16.mxu0 %v237_v32  ;;  %v99_v24 = vld [vmem:[%s6395_s0 + $0x18] sm:$0xff] }
  0xb7   :  { %2063 = vmatpush1.bf16.msra.mxu1 %v4512_v25  ;;  %1614 = vmatprep.subr.bf16.mxu0 %v4517_v26  ;;  %v106_v25 = vld [vmem:[%s6395_s0 + $0x50] sm:$0xff]  ;;  %v4560_v26 = vld [vmem:[%s6396_s1 + $0x3a8] ss:$16 sps:$4 sm:$0xff]  }
  0xb8   :  { %2064 = vmatprep.subr.bf16.mxu1 %v4520_v27  ;;  %v4565_v27 = vld [vmem:[%s6396_s1 + $0x3e4] ss:$16 sps:$4 sm:$0xff]   ;;  %v211_v33 = vpack.c.bf16 %v106_v25, %v99_v24  ;;  %v4608_v24 = vld [vmem:[%s6396_s1 + $0x4a8] ss:$16 sps:$4 sm:$0xff]  }
  0xba   :  { %2002 = vmatmul.mubr.bf16.gmra.mrb[44].mxu1 %v229_v21  ;;  %1615 = vmatpush1.bf16.msra.mxu0 %v4515_v28  ;;  %v4562_v21 = vld [vmem:[%s6396_s1 + $0x3ac] ss:$16 sps:$4 sm:$0xff]  }
  0xbb   :  { %2065 = vmatpush1.bf16.msra.mxu1 %v4518_v30  ;;  %1616 = vmatprep.subr.bf16.mxu0 %v4523_v35  ;;  %v4568_v28 = vld [vmem:[%s6396_s1 + $0x3cc] ss:$16 sps:$4 sm:$0xff]   ;;  %v4563_v30 = vld [vmem:[%s6396_s1 + $0x3e0] ss:$16 sps:$4 sm:$0xff]  }
  0xbc   :  { %2066 = vmatprep.subr.bf16.mxu1 %v4526_v36  ;;  %2011 = vmatprep.mubr.bf16.mxu1 %v237_v32  ;;  %v4566_v32 = vld [vmem:[%s6396_s1 + $0x3c8] ss:$16 sps:$4 sm:$0xff]   ;;  %v4571_v36 = vld [vmem:[%s6396_s1 + $0x404] ss:$16 sps:$4 sm:$0xff]  }
  0xbd   :  { %1560 = vmatmul.mubr.bf16.gmra.mrb[16].mxu0 %v236_v38  ;;  %v105_v35 = vld [vmem:[%s6395_s0 + $0x48] sm:$0xff] }
  0xbe   :  { %1617 = vmatpush1.bf16.msra.mxu0 %v4521_v37  ;;  %1569 = vmatprep.mubr.bf16.mxu0 %v244_v46  ;;  %v4574_v37 = vld [vmem:[%s6396_s1 + $0x3ec] ss:$16 sps:$4 sm:$0xff]  }
  0xbf   :  { %2067 = vmatpush1.bf16.msra.mxu1 %v4524_v39  ;;  %1618 = vmatprep.subr.bf16.mxu0 %v4529_v43  ;;  %v113_v39 = vld [vmem:[%s6395_s0 + $0x88] sm:$0xff] }
  0xc0   :  { %2068 = vmatprep.subr.bf16.mxu1 %v4532_v44  ;;  %v4572_v43 = vld [vmem:[%s6396_s1 + $0x3e8] ss:$16 sps:$4 sm:$0xff]   ;;  %v4577_v44 = vld [vmem:[%s6396_s1 + $0x424] ss:$16 sps:$4 sm:$0xff]   ;;  %v218_v48 = vpack.c.bf16 %v120_v40, %v113_v39 }
  0xc1   :  { %v169_v40 = vld [vmem:[%s6395_s0 + $0x248] sm:$0xff] }
  0xc2   :  { %2012 = vmatmul.mubr.bf16.gmra.mrb[48].mxu1 %v236_v38  ;;  %1619 = vmatpush1.bf16.msra.mxu0 %v4527_v45  ;;  %v210_v38 = vpack.c.bf16 %v105_v35, %v98_v34  ;;  %v4580_v45 = vld [vmem:[%s6396_s1 + $0x40c] ss:$16 sps:$4 sm:$0xff]   ;;  %v4614_v34 = vld [vmem:[%s6396_s1 + $0x4c8] ss:$16 sps:$4 sm:$0xff]   ;;  %v154_v35 = vld [vmem:[%s6395_s0 + $0x1d0] sm:$0xff] }
  0xc3   :  { %2069 = vmatpush1.bf16.msra.mxu1 %v4530_v47  ;;  %1620 = vmatprep.subr.bf16.mxu0 %v4535_v50  ;;  %v4578_v47 = vld [vmem:[%s6396_s1 + $0x408] ss:$16 sps:$4 sm:$0xff]  }
  0xc4   :  { %2070 = vmatprep.subr.bf16.mxu1 %v4538_v51  ;;  %2021 = vmatprep.mubr.bf16.mxu1 %v244_v46  ;;  %v4575_v46 = vld [vmem:[%s6396_s1 + $0x420] ss:$16 sps:$4 sm:$0xff]   ;;  %v119_v50 = vld [vmem:[%s6395_s0 + $0xb8] sm:$0xff]  ;;  %v4583_v51 = vld [vmem:[%s6396_s1 + $0x444] ss:$16 sps:$4 sm:$0xff]  }
  0xc5   :  { %1570 = vmatmul.mubr.bf16.gmra.mrb[20].mxu0 %v243_v55 }
  0xc6   :  { %1621 = vmatpush1.bf16.msra.mxu0 %v4533_v52  ;;  %1579 = vmatprep.mubr.bf16.mxu0 %v251_v60  ;;  %v4586_v52 = vld [vmem:[%s6396_s1 + $0x42c] ss:$16 sps:$4 sm:$0xff]  }
  0xc7   :  { %2071 = vmatpush1.bf16.msra.mxu1 %v4536_v54  ;;  %1622 = vmatprep.subr.bf16.mxu0 %v4541_v58  ;;  %v4581_v54 = vld [vmem:[%s6396_s1 + $0x440] ss:$16 sps:$4 sm:$0xff]  }
  0xc8   :  { %2072 = vmatprep.subr.bf16.mxu1 %v4544_v59  ;;  %v134_v58 = vld [vmem:[%s6395_s0 + $0x130] sm:$0xff] }
  0xc9   :  { %v4589_v59 = vld [vmem:[%s6396_s1 + $0x464] ss:$16 sps:$4 sm:$0xff]  }
  0xca   :  { %2022 = vmatmul.mubr.bf16.gmra.mrb[52].mxu1 %v243_v55  ;;  %1623 = vmatpush1.bf16.msra.mxu0 %v4539_v61  ;;  %v217_v55 = vpack.c.bf16 %v119_v50, %v112_v49  ;;  %v4587_v61 = vld [vmem:[%s6396_s1 + $0x460] ss:$16 sps:$4 sm:$0xff]   ;;  %v4626_v49 = vld [vmem:[%s6396_s1 + $0x508] ss:$16 sps:$4 sm:$0xff]  }
  0xcb   :  { %2073 = vmatpush1.bf16.msra.mxu1 %v4542_v62  ;;  %1624 = vmatprep.subr.bf16.mxu0 %v4547_v3  ;;  %v225_v62 = vpack.c.bf16 %v134_v58, %v127_v57  ;;  %v133_v3 = vld [vmem:[%s6395_s0 + $0x128] sm:$0xff]  ;;  %v168_v50 = vld [vmem:[%s6395_s0 + $0x240] sm:$0xff] }
  0xcc   :  { %2074 = vmatprep.subr.bf16.mxu1 %v4550_v4  ;;  %2031 = vmatprep.mubr.bf16.mxu1 %v251_v60  ;;  %v4592_v60 = vld [vmem:[%s6396_s1 + $0x44c] ss:$16 sps:$4 sm:$0xff]   ;;  %v4595_v4 = vld [vmem:[%s6396_s1 + $0x484] ss:$16 sps:$4 sm:$0xff]   ;;  %v224_v9 = vpack.c.bf16 %v133_v3, %v126_v2 }
  0xcd   :  { %1580 = vmatmul.mubr.bf16.gmra.mrb[24].mxu0 %v250_v7  ;;  %v4637_v58 = vld [vmem:[%s6396_s1 + $0x564] ss:$16 sps:$4 sm:$0xff]  }
  0xce   :  { %1625 = vmatpush1.bf16.msra.mxu0 %v4545_v5  ;;  %1589 = vmatprep.mubr.bf16.mxu0 %v258_v14  ;;  %v4598_v5 = vld [vmem:[%s6396_s1 + $0x46c] ss:$16 sps:$4 sm:$0xff]   ;;  %v182_v3 = vld [vmem:[%s6395_s0 + $0x2b0] sm:$0xff] }
  0xcf   :  { %2075 = vmatpush1.bf16.msra.mxu1 %v4548_v6  ;;  %1626 = vmatprep.subr.bf16.mxu0 %v4553_v11  ;;  %v4593_v6 = vld [vmem:[%s6396_s1 + $0x480] ss:$16 sps:$4 sm:$0xff]  }
  0xd0   :  { %2076 = vmatprep.subr.bf16.mxu1 %v4556_v12  ;;  %v148_v11 = vld [vmem:[%s6395_s0 + $0x1a0] sm:$0xff] }
  0xd1   :  { %v4601_v12 = vld [vmem:[%s6396_s1 + $0x4a4] ss:$16 sps:$4 sm:$0xff]  }
  0xd2   :  { %2032 = vmatmul.mubr.bf16.gmra.mrb[56].mxu1 %v250_v7  ;;  %1627 = vmatpush1.bf16.msra.mxu0 %v4551_v13  ;;  %v4596_v7 = vld [vmem:[%s6396_s1 + $0x468] ss:$16 sps:$4 sm:$0xff]   ;;  %v4604_v13 = vld [vmem:[%s6396_s1 + $0x48c] ss:$16 sps:$4 sm:$0xff]  }
  0xd3   :  { %2077 = vmatpush1.bf16.msra.mxu1 %v4554_v15  ;;  %1628 = vmatprep.subr.bf16.mxu0 %v4559_v20  ;;  %v4599_v15 = vld [vmem:[%s6396_s1 + $0x4a0] ss:$16 sps:$4 sm:$0xff]   ;;  %v147_v20 = vld [vmem:[%s6395_s0 + $0x198] sm:$0xff] }
  0xd4   :  { %2078 = vmatprep.subr.bf16.mxu1 %v4562_v21  ;;  %2041 = vmatprep.mubr.bf16.mxu1 %v258_v14  ;;  %v232_v14 = vpack.c.bf16 %v148_v11, %v141_v10  ;;  %v4607_v21 = vld [vmem:[%s6396_s1 + $0x4c4] ss:$16 sps:$4 sm:$0xff]   ;;  %v231_v25 = vpack.c.bf16 %v147_v20, %v140_v18  ;;  %v4641_v10 = vld [vmem:[%s6396_s1 + $0x580] ss:$16 sps:$4 sm:$0xff]   ;;  %v4644_v11 = vld [vmem:[%s6396_s1 + $0x568] ss:$16 sps:$4 sm:$0xff]  }
  0xd5   :  { %1590 = vmatmul.mubr.bf16.gmra.mrb[28].mxu0 %v257_v23  ;;  %v196_v20 = vld [vmem:[%s6395_s0 + $0x320] sm:$0xff] }
  0xd6   :  { %1629 = vmatpush1.bf16.msra.mxu0 %v4557_v22  ;;  %1632 = vmatprep.mubr.bf16.mxu0 %v211_v33  ;;  %v4610_v22 = vld [vmem:[%s6396_s1 + $0x4ac] ss:$16 sps:$4 sm:$0xff]  }
  0xd7   :  { %2079 = vmatpush1.bf16.msra.mxu1 %v4560_v26  ;;  %1630 = vmatprep.subr.bf16.mxu0 %v4565_v27  ;;  %v155_v26 = vld [vmem:[%s6395_s0 + $0x1d8] sm:$0xff]  ;;  %v162_v27 = vld [vmem:[%s6395_s0 + $0x210] sm:$0xff] }
  0xd8   :  { %2080 = vmatprep.subr.bf16.mxu1 %v4568_v28  ;;  %v4613_v28 = vld [vmem:[%s6396_s1 + $0x4e4] ss:$16 sps:$4 sm:$0xff]  }
  0xda   :  { %2042 = vmatmul.mubr.bf16.gmra.mrb[60].mxu1 %v257_v23  ;;  %1631 = vmatpush1.bf16.msra.mxu0 %v4563_v30  ;;  %v4605_v23 = vld [vmem:[%s6396_s1 + $0x4c0] ss:$16 sps:$4 sm:$0xff]   ;;  %v4616_v30 = vld [vmem:[%s6396_s1 + $0x4cc] ss:$16 sps:$4 sm:$0xff]  }
  0xdb   :  { %2081 = vmatpush1.bf16.msra.mxu1 %v4566_v32  ;;  %1713 = vmatprep.subr.bf16.mxu0 %v4571_v36  ;;  %v4611_v32 = vld [vmem:[%s6396_s1 + $0x4e0] ss:$16 sps:$4 sm:$0xff]   ;;  %v161_v36 = vld [vmem:[%s6395_s0 + $0x208] sm:$0xff] }
  0xdc   :  { %2082 = vmatprep.subr.bf16.mxu1 %v4574_v37  ;;  %2084 = vmatprep.mubr.bf16.mxu1 %v211_v33  ;;  %v239_v33 = vpack.c.bf16 %v162_v27, %v155_v26  ;;  %v4619_v37 = vld [vmem:[%s6396_s1 + $0x504] ss:$16 sps:$4 sm:$0xff]   ;;  %v238_v39 = vpack.c.bf16 %v161_v36, %v154_v35  ;;  %v4653_v26 = vld [vmem:[%s6396_s1 + $0x5c0] ss:$16 sps:$4 sm:$0xff]   ;;  %v4656_v27 = vld [vmem:[%s6396_s1 + $0x5a8] ss:$16 sps:$4 sm:$0xff]  }
  0xdd   :  { %1633 = vmatmul.mubr.bf16.vlgmr.msra.gmra.mrb[0].mxu0 %v210_v38  ;;  %v100_v36 = vld [vmem:[%s6395_s0 + $0x20] sm:$0xff] }
  0xde   :  { %1714 = vmatpush1.bf16.msra.mxu0 %v4569_v41  ;;  %1642 = vmatprep.mubr.bf16.mxu0 %v218_v48  ;;  %v176_v41 = vld [vmem:[%s6395_s0 + $0x280] sm:$0xff] }
  0xdf   :  { %2083 = vmatpush1.bf16.msra.mxu1 %v4572_v43  ;;  %1715 = vmatprep.subr.bf16.mxu0 %v4577_v44  ;;  %v4617_v43 = vld [vmem:[%s6396_s1 + $0x500] ss:$16 sps:$4 sm:$0xff]   ;;  %v4620_v44 = vld [vmem:[%s6396_s1 + $0x4e8] ss:$16 sps:$4 sm:$0xff]  }
  0xe0   :  { %2165 = vmatprep.subr.bf16.mxu1 %v4580_v45  ;;  %v4625_v45 = vld [vmem:[%s6396_s1 + $0x524] ss:$16 sps:$4 sm:$0xff]  }
  0xe2   :  { %2085 = vmatmul.mubr.bf16.vlgmr.msra.gmra.mrb[32].mxu1 %v210_v38  ;;  %1716 = vmatpush1.bf16.msra.mxu0 %v4575_v46  ;;  %v4622_v38 = vld [vmem:[%s6396_s1 + $0x4ec] ss:$16 sps:$4 sm:$0xff]  }
  0xe3   :  { %2166 = vmatpush1.bf16.msra.mxu1 %v4578_v47  ;;  %1717 = vmatprep.subr.bf16.mxu0 %v4583_v51  ;;  %v4628_v46 = vld [vmem:[%s6396_s1 + $0x50c] ss:$16 sps:$4 sm:$0xff]   ;;  %v246_v47 = vpack.c.bf16 %v176_v41, %v169_v40  ;;  %v122_v40 = vld [vmem:[%s6395_s0 + $0xd0] sm:$0xff] }
  0xe4   :  { %2167 = vmatprep.subr.bf16.mxu1 %v4586_v52  ;;  %2094 = vmatprep.mubr.bf16.mxu1 %v218_v48  ;;  %v4623_v48 = vld [vmem:[%s6396_s1 + $0x520] ss:$16 sps:$4 sm:$0xff]   ;;  %v175_v51 = vld [vmem:[%s6395_s0 + $0x278] sm:$0xff]  ;;  %v4631_v52 = vld [vmem:[%s6396_s1 + $0x544] ss:$16 sps:$4 sm:$0xff]  }
  0xe5   :  { %1643 = vmatmul.mubr.bf16.gmra.mrb[4].mxu0 %v217_v55  ;;  %v245_v57 = vpack.c.bf16 %v175_v51, %v168_v50  ;;  %v114_v50 = vld [vmem:[%s6395_s0 + $0x90] sm:$0xff]  ;;  %v121_v51 = vld [vmem:[%s6395_s0 + $0xc8] sm:$0xff] }
  0xe6   :  { %1718 = vmatpush1.bf16.msra.mxu0 %v4581_v54  ;;  %1652 = vmatprep.mubr.bf16.mxu0 %v225_v62  ;;  %v4634_v54 = vld [vmem:[%s6396_s1 + $0x52c] ss:$16 sps:$4 sm:$0xff]  }
  0xe7   :  { %2168 = vmatpush1.bf16.msra.mxu1 %v4584_v56  ;;  %1719 = vmatprep.subr.bf16.mxu0 %v4589_v59  ;;  %v4632_v56 = vld [vmem:[%s6396_s1 + $0x528] ss:$16 sps:$4 sm:$0xff]   ;;  %v4640_v59 = vld [vmem:[%s6396_s1 + $0x54c] ss:$16 sps:$4 sm:$0xff]  }
  0xe8   :  { %2169 = vmatprep.subr.bf16.mxu1 %v4592_v60  ;;  %v183_v60 = vld [vmem:[%s6395_s0 + $0x2b8] sm:$0xff] }
  0xea   :  { %2095 = vmatmul.mubr.bf16.gmra.mrb[36].mxu1 %v217_v55  ;;  %1720 = vmatpush1.bf16.msra.mxu0 %v4587_v61  ;;  %v4629_v55 = vld [vmem:[%s6396_s1 + $0x540] ss:$16 sps:$4 sm:$0xff]  }
  0xeb   :  { %2170 = vmatpush1.bf16.msra.mxu1 %v4590_v63  ;;  %1721 = vmatprep.subr.bf16.mxu0 %v4595_v4  ;;  %v190_v61 = vld [vmem:[%s6395_s0 + $0x2f0] sm:$0xff]  ;;  %v4638_v63 = vld [vmem:[%s6396_s1 + $0x548] ss:$16 sps:$4 sm:$0xff]  }
  0xec   :  { %2171 = vmatprep.subr.bf16.mxu1 %v4598_v5  ;;  %2104 = vmatprep.mubr.bf16.mxu1 %v225_v62  ;;  %v4635_v62 = vld [vmem:[%s6396_s1 + $0x560] ss:$16 sps:$4 sm:$0xff]   ;;  %v253_v2 = vpack.c.bf16 %v190_v61, %v183_v60  ;;  %v189_v4 = vld [vmem:[%s6395_s0 + $0x2e8] sm:$0xff]  ;;  %v4643_v5 = vld [vmem:[%s6396_s1 + $0x584] ss:$16 sps:$4 sm:$0xff]  }
  0xed   :  { %1653 = vmatmul.mubr.bf16.gmra.mrb[8].mxu0 %v224_v9  ;;  %v128_v60 = vld [vmem:[%s6395_s0 + $0x100] sm:$0xff]  ;;  %v135_v61 = vld [vmem:[%s6395_s0 + $0x138] sm:$0xff] }
  0xee   :  { %1722 = vmatpush1.bf16.msra.mxu0 %v4593_v6  ;;  %1662 = vmatprep.mubr.bf16.mxu0 %v232_v14  ;;  %v4646_v6 = vld [vmem:[%s6396_s1 + $0x56c] ss:$16 sps:$4 sm:$0xff]  }
  0xef   :  { %2172 = vmatpush1.bf16.msra.mxu1 %v4596_v7  ;;  %1723 = vmatprep.subr.bf16.mxu0 %v4601_v12  ;;  %v197_v7 = vld [vmem:[%s6395_s0 + $0x328] sm:$0xff]  ;;  %v252_v12 = vpack.c.bf16 %v189_v4, %v182_v3  ;;  %v4680_v3 = vld [vmem:[#allocation5 + $0x30] ss:$8 sps:$4 sm:$0xff]  }
  0xf0   :  { %2173 = vmatprep.subr.bf16.mxu1 %v4604_v13  ;;  %v4649_v13 = vld [vmem:[%s6396_s1 + $0x5a4] ss:$16 sps:$4 sm:$0xff]   ;;  %v4685_v4 = vld [vmem:[#allocation5 + $0x44] ss:$8 sps:$4 sm:$0xff]  }
  0xf2   :  { %2105 = vmatmul.mubr.bf16.gmra.mrb[40].mxu1 %v224_v9  ;;  %1724 = vmatpush1.bf16.msra.mxu0 %v4599_v15  ;;  %v204_v9 = vld [vmem:[%s6395_s0 + $0x360] sm:$0xff] }
  0xf3   :  { %2174 = vmatpush1.bf16.msra.mxu1 %v4602_v17  ;;  %1725 = vmatprep.subr.bf16.mxu0 %v4607_v21  ;;  %v4647_v15 = vld [vmem:[%s6396_s1 + $0x5a0] ss:$16 sps:$4 sm:$0xff]   ;;  %v4650_v17 = vld [vmem:[%s6396_s1 + $0x588] ss:$16 sps:$4 sm:$0xff]   ;;  %v260_v18 = vpack.c.bf16 %v204_v9, %v197_v7 }
  0xf4   :  { %2175 = vmatprep.subr.bf16.mxu1 %v4610_v22  ;;  %2114 = vmatprep.mubr.bf16.mxu1 %v232_v14  ;;  %v4652_v14 = vld [vmem:[%s6396_s1 + $0x58c] ss:$16 sps:$4 sm:$0xff]   ;;  %v4655_v22 = vld [vmem:[%s6396_s1 + $0x5c4] ss:$16 sps:$4 sm:$0xff]   ;;  %v4688_v9 = vld [vmem:[#allocation5 + $0x54] ss:$8 sps:$4 sm:$0xff]  }
  0xf5   :  { %1663 = vmatmul.mubr.bf16.gmra.mrb[12].mxu0 %v231_v25  ;;  %v203_v21 = vld [vmem:[%s6395_s0 + $0x358] sm:$0xff] }
  0xf6   :  { %1726 = vmatpush1.bf16.msra.mxu0 %v4605_v23  ;;  %1672 = vmatprep.mubr.bf16.mxu0 %v239_v33  ;;  %v4658_v23 = vld [vmem:[%s6396_s1 + $0x5ac] ss:$16 sps:$4 sm:$0xff]  }
  0xf7   :  { %2176 = vmatpush1.bf16.msra.mxu1 %v4608_v24  ;;  %1727 = vmatprep.subr.bf16.mxu0 %v4613_v28  ;;  %v101_v24 = vld [vmem:[%s6395_s0 + $0x28] sm:$0xff]  ;;  %v259_v28 = vpack.c.bf16 %v203_v21, %v196_v20 }
  0xf8   :  { %2177 = vmatprep.subr.bf16.mxu1 %v4616_v30  ;;  %v4661_v30 = vld [vmem:[%s6396_s1 + $0x5e4] ss:$16 sps:$4 sm:$0xff]  }
  0xf9   :  { %v4689_v20 = vld [vmem:[#allocation5 + $0x60] ss:$8 sps:$4 sm:$0xff]  }
  0xfa   :  { %2115 = vmatmul.mubr.bf16.gmra.mrb[44].mxu1 %v231_v25  ;;  %1728 = vmatpush1.bf16.msra.mxu0 %v4611_v32  ;;  %v108_v25 = vld [vmem:[%s6395_s0 + $0x60] sm:$0xff]  ;;  %v4664_v32 = vld [vmem:[%s6396_s1 + $0x5cc] ss:$16 sps:$4 sm:$0xff]  }
  0xfb   :  { %2178 = vmatpush1.bf16.msra.mxu1 %v4614_v34  ;;  %1729 = vmatprep.subr.bf16.mxu0 %v4619_v37  ;;  %v4662_v34 = vld [vmem:[%s6396_s1 + $0x5c8] ss:$16 sps:$4 sm:$0xff]   ;;  %v213_v35 = vpack.c.bf16 %v108_v25, %v101_v24  ;;  %v156_v25 = vld [vmem:[%s6395_s0 + $0x1e0] sm:$0xff] }
  0xfc   :  { %2179 = vmatprep.subr.bf16.mxu1 %v4622_v38  ;;  %2124 = vmatprep.mubr.bf16.mxu1 %v239_v33  ;;  %v4659_v33 = vld [vmem:[%s6396_s1 + $0x5e0] ss:$16 sps:$4 sm:$0xff]   ;;  %v107_v37 = vld [vmem:[%s6395_s0 + $0x58] sm:$0xff] }
  0xfd   :  { %1673 = vmatmul.mubr.bf16.gmra.mrb[16].mxu0 %v238_v39  ;;  %v4667_v38 = vld [vmem:[%s6396_s1 + $0x5ec] ss:$16 sps:$4 sm:$0xff]   ;;  %v212_v41 = vpack.c.bf16 %v107_v37, %v100_v36 }
  0xfe   :  { %1730 = vmatpush1.bf16.msra.mxu0 %v4617_v43  ;;  %1682 = vmatprep.mubr.bf16.mxu0 %v246_v47  ;;  %v4673_v43 = vld [vmem:[#allocation5 + $0x4] ss:$8 sps:$4 sm:$0xff]   ;;  %v4695_v36 = vld [vmem:[#allocation5 + $0x80] ss:$8 sps:$4 sm:$0xff]  }
  0xff   :  { %2180 = vmatpush1.bf16.msra.mxu1 %v4620_v44  ;;  %1731 = vmatprep.subr.bf16.mxu0 %v4625_v45  ;;  %v4665_v44 = vld [vmem:[%s6396_s1 + $0x5e8] ss:$16 sps:$4 sm:$0xff]  }
 0x100   :  { %2181 = vmatprep.subr.bf16.mxu1 %v4628_v46  ;;  %v4670_v46 = vld [vmem:[%s6396_s1 + $0x60c] ss:$16 sps:$4 sm:$0xff]  }
 0x102   :  { %2125 = vmatmul.mubr.bf16.gmra.mrb[48].mxu1 %v238_v39  ;;  %1732 = vmatpush1.bf16.msra.mxu0 %v4623_v48  ;;  %v115_v39 = vld [vmem:[%s6395_s0 + $0x98] sm:$0xff] }
 0x103   :  { %2182 = vmatpush1.bf16.msra.mxu1 %v4626_v49  ;;  %1733 = vmatprep.subr.bf16.mxu0 %v4631_v52  ;;  %v220_v45 = vpack.c.bf16 %v122_v40, %v115_v39  ;;  %v4676_v48 = vld [vmem:[#allocation5 + $0x14] ss:$8 sps:$4 sm:$0xff]   ;;  %v129_v52 = vld [vmem:[%s6395_s0 + $0x108] sm:$0xff] }
 0x104   :  { %2183 = vmatprep.subr.bf16.mxu1 %v4634_v54  ;;  %2134 = vmatprep.mubr.bf16.mxu1 %v246_v47  ;;  %v4671_v47 = vld [vmem:[#allocation5] ss:$8 sps:$4 sm:$0xff]   ;;  %v4668_v49 = vld [vmem:[%s6396_s1 + $0x608] ss:$16 sps:$4 sm:$0xff]  }
 0x105   :  { %1683 = vmatmul.mubr.bf16.gmra.mrb[20].mxu0 %v245_v57  ;;  %v136_v54 = vld [vmem:[%s6395_s0 + $0x140] sm:$0xff] }
 0x106   :  { %1734 = vmatpush1.bf16.msra.mxu0 %v4629_v55  ;;  %1692 = vmatprep.mubr.bf16.mxu0 %v253_v2  ;;  %v4674_v55 = vld [vmem:[#allocation5 + $0x10] ss:$8 sps:$4 sm:$0xff]  }
 0x107   :  { %2184 = vmatpush1.bf16.msra.mxu1 %v4632_v56  ;;  %1735 = vmatprep.subr.bf16.mxu0 %v4637_v58  ;;  %v4679_v56 = vld [vmem:[#allocation5 + $0x24] ss:$8 sps:$4 sm:$0xff]   ;;  %v227_v58 = vpack.c.bf16 %v136_v54, %v129_v52  ;;  %v4706_v54 = vld [vmem:[#allocation5 + $0xb4] ss:$8 sps:$4 sm:$0xff]  }
 0x108   :  { %2185 = vmatprep.subr.bf16.mxu1 %v4640_v59  ;;  %v4677_v59 = vld [vmem:[#allocation5 + $0x20] ss:$8 sps:$4 sm:$0xff]  }
 0x10a   :  { %2135 = vmatmul.mubr.bf16.gmra.mrb[52].mxu1 %v245_v57  ;;  %1736 = vmatpush1.bf16.msra.mxu0 %v4635_v62  ;;  %v219_v57 = vpack.c.bf16 %v121_v51, %v114_v50  ;;  %v4682_v62 = vld [vmem:[#allocation5 + $0x34] ss:$8 sps:$4 sm:$0xff]   ;;  %v4701_v51 = vld [vmem:[#allocation5 + $0xa0] ss:$8 sps:$4 sm:$0xff]  }
 0x10b   :  { %2186 = vmatpush1.bf16.msra.mxu1 %v4638_v63  ;;  %1737 = vmatprep.subr.bf16.mxu0 %v4643_v5  ;;  %v143_v63 = vld [vmem:[%s6395_s0 + $0x178] sm:$0xff]  ;;  %v226_v5 = vpack.c.bf16 %v135_v61, %v128_v60  ;;  %v206_v61 = vld [vmem:[%s6395_s0 + $0x370] sm:$0xff] }
 0x10c   :  { %2187 = vmatprep.subr.bf16.mxu1 %v4646_v6  ;;  %2144 = vmatprep.mubr.bf16.mxu1 %v253_v2  ;;  %v150_v2 = vld [vmem:[%s6395_s0 + $0x1b0] sm:$0xff]  ;;  %v4683_v6 = vld [vmem:[#allocation5 + $0x40] ss:$8 sps:$4 sm:$0xff]   ;;  %v199_v60 = vld [vmem:[%s6395_s0 + $0x338] sm:$0xff] }
 0x10d   :  { %1693 = vmatmul.mubr.bf16.gmra.mrb[24].mxu0 %v252_v12  ;;  %v234_v7 = vpack.c.bf16 %v150_v2, %v143_v63  ;;  %v4709_v63 = vld [vmem:[#allocation5 + $0xc4] ss:$8 sps:$4 sm:$0xff]  }
 0x10e   :  { %1738 = vmatpush1.bf16.msra.mxu0 %v4641_v10  ;;  %1702 = vmatprep.mubr.bf16.mxu0 %v260_v18  ;;  %v142_v10 = vld [vmem:[%s6395_s0 + $0x170] sm:$0xff] }
 0x10f   :  { %2188 = vmatpush1.bf16.msra.mxu1 %v4644_v11  ;;  %1739 = vmatprep.subr.bf16.mxu0 %v4649_v13  ;;  %v149_v11 = vld [vmem:[%s6395_s0 + $0x1a8] sm:$0xff]  ;;  %v164_v13 = vld [vmem:[%s6395_s0 + $0x220] sm:$0xff] }
 0x110   :  { %2189 = vmatprep.subr.bf16.mxu1 %v4652_v14  ;;  %v4686_v14 = vld [vmem:[#allocation5 + $0x50] ss:$8 sps:$4 sm:$0xff]  }
 0x112   :  { %2145 = vmatmul.mubr.bf16.gmra.mrb[56].mxu1 %v252_v12  ;;  %1740 = vmatpush1.bf16.msra.mxu0 %v4647_v15  ;;  %v157_v12 = vld [vmem:[%s6395_s0 + $0x1e8] sm:$0xff] }
 0x113   :  { %2190 = vmatpush1.bf16.msra.mxu1 %v4650_v17  ;;  %1741 = vmatprep.subr.bf16.mxu0 %v4655_v22  ;;  %v4691_v15 = vld [vmem:[#allocation5 + $0x64] ss:$8 sps:$4 sm:$0xff]   ;;  %v233_v17 = vpack.c.bf16 %v149_v11, %v142_v10  ;;  %v4694_v22 = vld [vmem:[#allocation5 + $0x74] ss:$8 sps:$4 sm:$0xff]  }
 0x114   :  { %2191 = vmatprep.subr.bf16.mxu1 %v4658_v23  ;;  %2154 = vmatprep.mubr.bf16.mxu1 %v260_v18  ;;  %v241_v18 = vpack.c.bf16 %v164_v13, %v157_v12  ;;  %v205_v10 = vld [vmem:[%s6395_s0 + $0x368] sm:$0xff] }
 0x115   :  { %1703 = vmatmul.mubr.bf16.gmra.mrb[28].mxu0 %v259_v28 }
 0x116   :  { %1742 = vmatpush1.bf16.msra.mxu0 %v4653_v26  ;;  %1745 = vmatprep.mubr.bf16.mxu0 %v213_v35  ;;  %v163_v26 = vld [vmem:[%s6395_s0 + $0x218] sm:$0xff] }
 0x117   :  { %2192 = vmatpush1.bf16.msra.mxu1 %v4656_v27  ;;  %1743 = vmatprep.subr.bf16.mxu0 %v4661_v30  ;;  %v178_v30 = vld [vmem:[%s6395_s0 + $0x290] sm:$0xff] }
 0x118   :  { %2193 = vmatprep.subr.bf16.mxu1 %v4664_v32  ;;  %v4692_v32 = vld [vmem:[#allocation5 + $0x70] ss:$8 sps:$4 sm:$0xff]  }
 0x11a   :  { %2155 = vmatmul.mubr.bf16.gmra.mrb[60].mxu1 %v259_v28  ;;  %1744 = vmatpush1.bf16.msra.mxu0 %v4659_v33  ;;  %v171_v28 = vld [vmem:[%s6395_s0 + $0x258] sm:$0xff]  ;;  %v4697_v33 = vld [vmem:[#allocation5 + $0x84] ss:$8 sps:$4 sm:$0xff]  }
 0x11b   :  { %2194 = vmatpush1.bf16.msra.mxu1 %v4662_v34  ;;  %2197 = vmatprep.mubr.bf16.mxu1 %v213_v35  ;;  %v240_v34 = vpack.c.bf16 %v163_v26, %v156_v25  ;;  %v248_v35 = vpack.c.bf16 %v178_v30, %v171_v28 }
 0x11c   :  { %2195 = vmatprep.subr.bf16.mxu1 %v4667_v38  ;;  %2883 = vmatprep.subr.bf16.mxu0 %v4673_v43  ;;  %v4700_v38 = vld [vmem:[#allocation5 + $0x94] ss:$8 sps:$4 sm:$0xff]   ;;  %v177_v43 = vld [vmem:[%s6395_s0 + $0x288] sm:$0xff] }
 0x11d   :  { %1746 = vmatmul.mubr.bf16.vlgmr.msra.gmra.mrb[0].mxu0 %v212_v41 }
 0x11e   :  { %1755 = vmatprep.mubr.bf16.mxu0 %v220_v45  ;;  %2884 = vmatpush1.bf16.msra.mxu0 %v4671_v47  ;;  %v4698_v47 = vld [vmem:[#allocation5 + $0x90] ss:$8 sps:$4 sm:$0xff]  }
 0x11f   :  { %2196 = vmatpush1.bf16.msra.mxu1 %v4665_v44  ;;  %2885 = vmatprep.subr.bf16.mxu0 %v4676_v48  ;;  %v4703_v48 = vld [vmem:[#allocation5 + $0xa4] ss:$8 sps:$4 sm:$0xff]  }
 0x120   :  { %2278 = vmatprep.subr.bf16.mxu1 %v4670_v46  ;;  %v192_v46 = vld [vmem:[%s6395_s0 + $0x300] sm:$0xff] }
 0x122   :  { %2198 = vmatmul.mubr.bf16.vlgmr.msra.gmra.mrb[32].mxu1 %v212_v41  ;;  %2886 = vmatpush1.bf16.msra.mxu0 %v4674_v55  ;;  %v170_v41 = vld [vmem:[%s6395_s0 + $0x250] sm:$0xff] }
 0x123   :  { %2279 = vmatpush1.bf16.msra.mxu1 %v4668_v49  ;;  %2207 = vmatprep.mubr.bf16.mxu1 %v220_v45  ;;  %v185_v45 = vld [vmem:[%s6395_s0 + $0x2c8] sm:$0xff]  ;;  %v247_v49 = vpack.c.bf16 %v177_v43, %v170_v41  ;;  %v4718_v43 = vld [vmem:[#allocation5 + $0xf4] ss:$8 sps:$4 sm:$0xff]  }
 0x124   :  { %2887 = vmatprep.subr.bf16.mxu0 %v4679_v56  ;;  %v255_v50 = vpack.c.bf16 %v192_v46, %v185_v45  ;;  %v4713_v41 = vld [vmem:[#allocation5 + $0xe0] ss:$8 sps:$4 sm:$0xff]   ;;  %v4716_v45 = vld [vmem:[#allocation5 + $0xf0] ss:$8 sps:$4 sm:$0xff]   ;;  %v4721_v46 = vld [vmem:[#allocation5 + $0x104] ss:$8 sps:$4 sm:$0xff]  }
 0x125   :  { %1756 = vmatmul.mubr.bf16.gmra.mrb[4].mxu0 %v219_v57 }
 0x126   :  { %1765 = vmatprep.mubr.bf16.mxu0 %v227_v58  ;;  %2888 = vmatpush1.bf16.msra.mxu0 %v4677_v59 }
 0x127   :  { %2889 = vmatprep.subr.bf16.mxu0 %v4682_v62  ;;  %v4704_v62 = vld [vmem:[#allocation5 + $0xb0] ss:$8 sps:$4 sm:$0xff]  }
 0x12a   :  { %2208 = vmatmul.mubr.bf16.gmra.mrb[36].mxu1 %v219_v57  ;;  %2890 = vmatpush1.bf16.msra.mxu0 %v4680_v3  ;;  %v184_v57 = vld [vmem:[%s6395_s0 + $0x2c0] sm:$0xff]  ;;  %v262_v3 = vpack.c.bf16 %v206_v61, %v199_v60 }
 0x12b   :  { %2217 = vmatprep.mubr.bf16.mxu1 %v227_v58  ;;  %2891 = vmatprep.subr.bf16.mxu0 %v4685_v4  ;;  %v191_v58 = vld [vmem:[%s6395_s0 + $0x2f8] sm:$0xff]  ;;  %v4707_v4 = vld [vmem:[#allocation5 + $0xc0] ss:$8 sps:$4 sm:$0xff]  }
 0x12c   :  { %v254_v2 = vpack.c.bf16 %v191_v58, %v184_v57 }
 0x12d   :  { %1766 = vmatmul.mubr.bf16.gmra.mrb[8].mxu0 %v226_v5 }
 0x12e   :  { %1775 = vmatprep.mubr.bf16.mxu0 %v234_v7  ;;  %2892 = vmatpush1.bf16.msra.mxu0 %v4683_v6 }
 0x12f   :  { %2893 = vmatprep.subr.bf16.mxu0 %v4688_v9  ;;  %v198_v9 = vld [vmem:[%s6395_s0 + $0x330] sm:$0xff] }
 0x130   :  { %v261_v12 = vpack.c.bf16 %v205_v10, %v198_v9 }
 0x132   :  { %2218 = vmatmul.mubr.bf16.gmra.mrb[40].mxu1 %v226_v5  ;;  %2894 = vmatpush1.bf16.msra.mxu0 %v4686_v14 }
 0x133   :  { %2227 = vmatprep.mubr.bf16.mxu1 %v234_v7  ;;  %2895 = vmatprep.subr.bf16.mxu0 %v4691_v15 }
 0x135   :  { %v5977_v21 = vpop.f32.mrb[0].mxu1  ;;  %1776 = vmatmul.mubr.bf16.gmra.mrb[12].mxu0 %v233_v17 }
 0x136   :  { %v5979_v23 = vpop.f32.mrb[1].mxu1  ;;  %1785 = vmatprep.mubr.bf16.mxu0 %v241_v18  ;;  %2896 = vmatpush1.bf16.msra.mxu0 %v4689_v20 }
 0x137   :  { %v5981_v24 = vpop.f32.mrb[2].mxu1  ;;  %2897 = vmatprep.subr.bf16.mxu0 %v4694_v22 }
 0x138   :  { %v5989_v27 = vpop.f32.mrb[3].mxu1 }
 0x13a   :  { %2228 = vmatmul.mubr.bf16.gmra.mrb[44].mxu1 %v233_v17  ;;  %2898 = vmatpush1.bf16.msra.mxu0 %v4692_v32 }
 0x13b   :  { %2237 = vmatprep.mubr.bf16.mxu1 %v241_v18  ;;  %2899 = vmatprep.subr.bf16.mxu0 %v4697_v33 }
 0x13d   :  { %v5997_v37 = vpop.f32.mrb[4].mxu1  ;;  %1786 = vmatmul.mubr.bf16.gmra.mrb[16].mxu0 %v240_v34 }
 0x13e   :  { %v5999_v39 = vpop.f32.mrb[5].mxu1  ;;  %1795 = vmatprep.mubr.bf16.mxu0 %v248_v35  ;;  %2900 = vmatpush1.bf16.msra.mxu0 %v4695_v36  ;;  %v4712_v36 = vld [vmem:[#allocation5 + $0xd4] ss:$8 sps:$4 sm:$0xff]  }
 0x13f   :  { %v6001_v40 = vpop.f32.mrb[6].mxu1  ;;  %2901 = vmatprep.subr.bf16.mxu0 %v4700_v38  ;;  %v4710_v38 = vld [vmem:[#allocation5 + $0xd0] ss:$8 sps:$4 sm:$0xff]  }
 0x140   :  { %v6009_v44 = vpop.f32.mrb[7].mxu1 }
 0x142   :  { %2238 = vmatmul.mubr.bf16.gmra.mrb[48].mxu1 %v240_v34  ;;  %2902 = vmatpush1.bf16.msra.mxu0 %v4698_v47  ;;  %v6110_v47 = vld [vmem:[#allocation2] sm:$0xf] }
 0x143   :  { %2247 = vmatprep.mubr.bf16.mxu1 %v248_v35  ;;  %2903 = vmatprep.subr.bf16.mxu0 %v4703_v48 }
 0x145   :  { %v6017_v52 = vpop.f32.mrb[8].mxu1  ;;  %1796 = vmatmul.mubr.bf16.gmra.mrb[20].mxu0 %v247_v49 }
 0x146   :  { %v6019_v55 = vpop.f32.mrb[9].mxu1  ;;  %1805 = vmatprep.mubr.bf16.mxu0 %v255_v50  ;;  %2904 = vmatpush1.bf16.msra.mxu0 %v4701_v51 }
 0x147   :  { %v6021_v56 = vpop.f32.mrb[10].mxu1  ;;  %2905 = vmatprep.subr.bf16.mxu0 %v4706_v54 }
 0x148   :  { %v6029_v59 = vpop.f32.mrb[11].mxu1 }
 0x14a   :  { %2248 = vmatmul.mubr.bf16.gmra.mrb[52].mxu1 %v247_v49  ;;  %2906 = vmatpush1.bf16.msra.mxu0 %v4704_v62 }
 0x14b   :  { %2257 = vmatprep.mubr.bf16.mxu1 %v255_v50  ;;  %2907 = vmatprep.subr.bf16.mxu0 %v4709_v63 }
 0x14d   :  { %v6037_v5 = vpop.f32.mrb[12].mxu1  ;;  %1806 = vmatmul.mubr.bf16.gmra.mrb[24].mxu0 %v254_v2 }
 0x14e   :  { %v6039_v6 = vpop.f32.mrb[13].mxu1  ;;  %1815 = vmatprep.mubr.bf16.mxu0 %v262_v3  ;;  %2908 = vmatpush1.bf16.msra.mxu0 %v4707_v4  ;;  %v6134_v4 = vld [vmem:[%s6400_s5 + $0x40] sm:$0xff]  }
 0x14f   :  { %v6041_v7 = vpop.f32.mrb[14].mxu1  ;;  %2909 = vmatprep.subr.bf16.mxu0 %v4712_v36  ;;  %4030 = vmatprep.subr.bf16.mxu1 %v6134_v4 }
 0x150   :  { %v6049_v11 = vpop.f32.mrb[15].mxu1 }
 0x152   :  { %2258 = vmatmul.mubr.bf16.gmra.mrb[56].mxu1 %v254_v2  ;;  %2910 = vmatpush1.bf16.msra.mxu0 %v4710_v38 }
 0x153   :  { %2267 = vmatprep.mubr.bf16.mxu1 %v262_v3 }
 0x155   :  { %v6051_v13 = vpop.f32.mrb[16].mxu1  ;;  %1816 = vmatmul.mubr.bf16.gmra.mrb[28].mxu0 %v261_v12 }
 0x156   :  { %v6053_v14 = vpop.f32.mrb[17].mxu1 }
 0x157   :  { %v6055_v15 = vpop.f32.mrb[18].mxu1 }
 0x158   :  { %v6057_v17 = vpop.f32.mrb[19].mxu1 }
 0x15a   :  { %2268 = vmatmul.mubr.bf16.gmra.mrb[60].mxu1 %v261_v12 }
 0x15b   :  { %2310 = vmatprep.mubr.bf16.mxu1 %v4940_v0 }
 0x15d   :  { %v6060_v18 = vpop.f32.mrb[20].mxu1 }
 0x15e   :  { %v6062_v20 = vpop.f32.mrb[21].mxu1 }
 0x15f   :  { %v6064_v22 = vpop.f32.mrb[22].mxu1 }
 0x160   :  { %v6066_v25 = vpop.f32.mrb[23].mxu1 }
 0x162   :  { %3820 = vmatmul.mubr.msk.bf16.vlgmr.msra.gmra.mrb[32].mxu1 %vm1462_vm0, %v5077_v8 }
 0x163   :  { %2320 = vmatprep.mubr.bf16.mxu1 %v4940_v0 }
 0x165   :  { %v6071_v26 = vpop.f32.mrb[24].mxu1 }
 0x166   :  { %v6073_v28 = vpop.f32.mrb[25].mxu1 }
 0x167   :  { %v6075_v30 = vpop.f32.mrb[26].mxu1 }
 0x168   :  { %v6077_v32 = vpop.f32.mrb[27].mxu1 }
 0x16a   :  { %3821 = vmatmul.mubr.msk.bf16.gmra.mrb[36].mxu1 %vm1462_vm0, %v5112_v19  ;;  %v4715_v19 = vld [vmem:[#allocation5 + $0xe4] ss:$8 sps:$4 sm:$0xff]  }
 0x16b   :  { %2330 = vmatprep.mubr.bf16.mxu1 %v4940_v0  ;;  %2911 = vmatprep.subr.bf16.mxu0 %v4715_v19 }
 0x16c   :  { %2912 = vmatpush1.bf16.msra.mxu0 %v4713_v41 }
 0x16d   :  { %v6082_v33 = vpop.f32.mrb[28].mxu1  ;;  %2913 = vmatprep.subr.bf16.mxu0 %v4718_v43  ;;  %v4719_v43 = vld [vmem:[#allocation5 + $0x100] ss:$8 sps:$4 sm:$0xff]  }
 0x16e   :  { %v6084_v34 = vpop.f32.mrb[29].mxu1 }
 0x16f   :  { %v6086_v8 = vpop.f32.mrb[30].mxu1 }
 0x170   :  { %v6088_v35 = vpop.f32.mrb[31].mxu1  ;;  %2914 = vmatpush1.bf16.msra.mxu0 %v4716_v45 }
 0x171   :  { %2996 = vmatprep.subr.bf16.mxu0 %v4721_v46 }
 0x172   :  { %3822 = vmatmul.mubr.msk.bf16.gmra.mrb[40].mxu1 %vm1462_vm0, %v5150_v31  ;;  %v462_v31 = vlaneseq }
 0x173   :  { %2340 = vmatprep.mubr.bf16.mxu1 %v4940_v0 }
 0x17a   :  { %3823 = vmatmul.mubr.msk.bf16.gmra.mrb[44].mxu1 %vm1462_vm0, %v5185_v42  ;;  %v6107_v42 = vshrl.u32 %v462_v31, 7 }
 0x17b   :  { %2350 = vmatprep.mubr.bf16.mxu1 %v4940_v0 }
 0x17c   :  { %v468_v48 = vsub.s32 1, %v6107_v42 }
 0x182   :  { %3824 = vmatmul.mubr.msk.bf16.gmra.mrb[48].mxu1 %vm1462_vm0, %v5220_v53  ;;  %v464_v53 = vsub.s32 0, %v6107_v42 }
 0x183   :  { %2360 = vmatprep.mubr.bf16.mxu1 %v4940_v0 }
 0x18a   :  { %3825 = vmatmul.mubr.msk.bf16.gmra.mrb[52].mxu1 %vm1462_vm0, %v5255_v1  ;;  %v6116_v1 = vrot.slane %v6110_v47, %v464_v53 }
 0x18b   :  { %2370 = vmatprep.mubr.bf16.mxu1 %v4940_v0 }
 0x192   :  { %3826 = vmatmul.mubr.msk.bf16.gmra.mrb[56].mxu1 %vm1462_vm0, %v5296_v16 }
 0x193   :  { %2380 = vmatprep.mubr.bf16.mxu1 %v4940_v0  ;;  %v6121_v0 = vrot.slane %v6110_v47, %v468_v48 }
 0x19a   :  { %3827 = vmatmul.mubr.msk.bf16.gmra.mrb[60].mxu1 %vm1462_vm0, %v5334_v29 }
 0x1f0   :  { %v1747_v16 = vpop.f32.mrb[0].mxu0 }
 0x1f1   :  { %v4046_v29 = vadd.f32 %v1747_v16, %v6116_v1  ;;  %v1749_v49 = vpop.f32.mrb[1].mxu0  ;;  %v4724_v16 = vld [vmem:[#allocation5 + $0x114] ss:$8 sps:$4 sm:$0xff]  }
 0x1f2   :  { %v4048_v50 = vadd.f32 %v1749_v49, %v6121_v0  ;;  %v1751_v51 = vpop.f32.mrb[2].mxu0 }
 0x1f3   :  { %v4047_v54 = vadd.f32 %v4046_v29, %v5977_v21  ;;  %v4050_v57 = vadd.f32 %v1751_v51, %v6116_v1  ;;  %v1753_v58 = vpop.f32.mrb[3].mxu0 }
 0x1f4   :  { %v4049_v60 = vadd.f32 %v4048_v50, %v5979_v23  ;;  %v4052_v61 = vadd.f32 %v1753_v58, %v6121_v0  ;;  %v6139_v23 = vld [vmem:[%s6400_s5] sm:$0xff]   ;;  %v6158_v50 = vld [vmem:[%s6400_s5 + $0x8] sm:$0xff]  }
 0x1f5   :  { %v4051_v62 = vadd.f32 %v4050_v57, %v5981_v24  ;;  %v2391_v2 = vmax.f32 %v4047_v54, 0.0  ;;  %4038 = vmatpush3.bf16.msra.mxu1 %v6139_v23 }
 0x1f6   :  { %v4053_v63 = vadd.f32 %v4052_v61, %v5989_v27  ;;  %v2392_v9 = vmax.f32 %v4049_v60, 0.0  ;;  %v6146_v27 = vld [vmem:[%s6400_s5 + $0x48] sm:$0xff]  }
 0x1f7   :  { %v2395_v3 = vmax.f32 %v4051_v62, 0.0  ;;  %4031 = vmatprep.subr.bf16.mxu1 %v6146_v27  ;;  %v4727_v60 = vld [vmem:[#allocation5 + $0x124] ss:$8 sps:$4 sm:$0xff]  }
 0x1f8   :  { %v2396_v21 = vmax.f32 %v4053_v63, 0.0  ;;  %v1757_v10 = vpop.f32.mrb[4].mxu0  ;;  %v6172_v63 = vld [vmem:[%s6400_s5 + $0x10] sm:$0xff]  }
 0x1f9   :  { %v2455_v12 = vpack.c.bf16 %v2395_v3, %v2391_v2  ;;  %v4054_v24 = vadd.f32 %v1757_v10, %v6116_v1  ;;  %v1759_v36 = vpop.f32.mrb[5].mxu0  ;;  %4039 = vmatpush3.bf16.msra.mxu1 %v6158_v50 }
 0x1fa   :  { %v4056_v38 = vadd.f32 %v1759_v36, %v6121_v0  ;;  %v1761_v19 = vpop.f32.mrb[6].mxu0  ;;  %v2456_v41 = vpack.c.bf16 %v2396_v21, %v2392_v9  ;;  %v6178_v9 = vld [vmem:[%s6400_s5 + $0x58] sm:$0xff]  }
 0x1fb   :  { %v4055_v45 = vadd.f32 %v4054_v24, %v5997_v37  ;;  %v4058_v46 = vadd.f32 %v1761_v19, %v6116_v1  ;;  %v1763_v31 = vpop.f32.mrb[7].mxu0  ;;  %v6164_v37 = vld [vmem:[%s6400_s5 + $0x50] sm:$0xff]   ;;  %v4725_v24 = vld [vmem:[#allocation5 + $0x120] ss:$8 sps:$4 sm:$0xff]  }
 0x1fc   :  { %v4057_v29 = vadd.f32 %v4056_v38, %v5999_v39  ;;  %v4060_v49 = vadd.f32 %v1763_v31, %v6121_v0  ;;  %2915 = vmatprep.mubr.bf16.mxu0 %v2456_v41  ;;  %v4722_v39 = vld [vmem:[#allocation5 + $0x110] ss:$8 sps:$4 sm:$0xff]   ;;  %4032 = vmatprep.subr.bf16.mxu1 %v6164_v37  ;;  %v4730_v41 = vld [vmem:[#allocation5 + $0x134] ss:$8 sps:$4 sm:$0xff]  }
 0x1fd   :  { %v4059_v51 = vadd.f32 %v4058_v46, %v6001_v40  ;;  %2916 = vmatmul.mubr.bf16.vlgmr.msra.gmra.mrb[32].mxu0 %v2455_v12  ;;  %v2399_v57 = vmax.f32 %v4055_v45, 0.0  ;;  %4040 = vmatpush3.bf16.msra.mxu1 %v6172_v63  ;;  %v6190_v46 = vld [vmem:[%s6400_s5 + $0x18] sm:$0xff]  }
 0x1fe   :  { %v4061_v54 = vadd.f32 %v4060_v49, %v6009_v44  ;;  %2997 = vmatpush1.bf16.msra.mxu0 %v4719_v43  ;;  %v2400_v61 = vmax.f32 %v4057_v29, 0.0  ;;  %4033 = vmatprep.subr.bf16.mxu1 %v6178_v9 }
 0x1ff   :  { %v2403_v58 = vmax.f32 %v4059_v51, 0.0  ;;  %2998 = vmatprep.subr.bf16.mxu0 %v4724_v16  ;;  %v4733_v51 = vld [vmem:[#allocation5 + $0x144] ss:$8 sps:$4 sm:$0xff]  }
 0x200   :  { %v2404_v40 = vmax.f32 %v4061_v54, 0.0  ;;  %v1767_v62 = vpop.f32.mrb[8].mxu0 }
 0x201   :  { %v4062_v44 = vadd.f32 %v1767_v62, %v6116_v1  ;;  %v1769_v2 = vpop.f32.mrb[9].mxu0  ;;  %v2459_v3 = vpack.c.bf16 %v2403_v58, %v2399_v57  ;;  %4041 = vmatpush3.bf16.msra.mxu1 %v6190_v46  ;;  %v6204_v57 = vld [vmem:[%s6400_s5 + $0x20] sm:$0xff]  }
 0x202   :  { %v4064_v21 = vadd.f32 %v1769_v2, %v6121_v0  ;;  %v1771_v10 = vpop.f32.mrb[10].mxu0  ;;  %v2460_v12 = vpack.c.bf16 %v2404_v40, %v2400_v61  ;;  %2999 = vmatpush1.bf16.msra.mxu0 %v4722_v39  ;;  %v6210_v61 = vld [vmem:[%s6400_s5 + $0x68] sm:$0xff]  }
 0x203   :  { %v4063_v36 = vadd.f32 %v4062_v44, %v6017_v52  ;;  %v4066_v38 = vadd.f32 %v1771_v10, %v6116_v1  ;;  %v1773_v19 = vpop.f32.mrb[11].mxu0  ;;  %3000 = vmatprep.subr.bf16.mxu0 %v4727_v60  ;;  %v6196_v52 = vld [vmem:[%s6400_s5 + $0x60] sm:$0xff]  }
 0x204   :  { %v4065_v43 = vadd.f32 %v4064_v21, %v6019_v55  ;;  %v4068_v45 = vadd.f32 %v1773_v19, %v6121_v0  ;;  %2925 = vmatprep.mubr.bf16.mxu0 %v2460_v12  ;;  %v4728_v55 = vld [vmem:[#allocation5 + $0x130] ss:$8 sps:$4 sm:$0xff]   ;;  %4034 = vmatprep.subr.bf16.mxu1 %v6196_v52  ;;  %v4731_v2 = vld [vmem:[#allocation5 + $0x140] ss:$8 sps:$4 sm:$0xff]   ;;  %v4736_v12 = vld [vmem:[#allocation5 + $0x154] ss:$8 sps:$4 sm:$0xff]  }
 0x205   :  { %v4067_v31 = vadd.f32 %v4066_v38, %v6021_v56  ;;  %2926 = vmatmul.mubr.bf16.gmra.mrb[36].mxu0 %v2459_v3  ;;  %v2407_v29 = vmax.f32 %v4063_v36, 0.0  ;;  %4042 = vmatpush3.bf16.msra.mxu1 %v6204_v57 }
 0x206   :  { %v4069_v16 = vadd.f32 %v4068_v45, %v6029_v59  ;;  %3001 = vmatpush1.bf16.msra.mxu0 %v4725_v24  ;;  %v2408_v54 = vmax.f32 %v4065_v43, 0.0  ;;  %4035 = vmatprep.subr.bf16.mxu1 %v6210_v61  ;;  %v4739_v45 = vld [vmem:[#allocation5 + $0x164] ss:$8 sps:$4 sm:$0xff]  }
 0x207   :  { %v2411_v49 = vmax.f32 %v4067_v31, 0.0  ;;  %3002 = vmatprep.subr.bf16.mxu0 %v4730_v41  ;;  %v4734_v41 = vld [vmem:[#allocation5 + $0x150] ss:$8 sps:$4 sm:$0xff]  }
 0x208   :  { %v2412_v56 = vmax.f32 %v4069_v16, 0.0  ;;  %v1777_v39 = vpop.f32.mrb[12].mxu0 }
 0x209   :  { %v4070_v59 = vadd.f32 %v1777_v39, %v6116_v1  ;;  %v1779_v58 = vpop.f32.mrb[13].mxu0  ;;  %v2463_v60 = vpack.c.bf16 %v2411_v49, %v2407_v29 }
 0x20a   :  { %v4072_v40 = vadd.f32 %v1779_v58, %v6121_v0  ;;  %v1781_v62 = vpop.f32.mrb[14].mxu0  ;;  %v2464_v44 = vpack.c.bf16 %v2412_v56, %v2408_v54  ;;  %3003 = vmatpush1.bf16.msra.mxu0 %v4728_v55  ;;  %v4737_v56 = vld [vmem:[#allocation5 + $0x160] ss:$8 sps:$4 sm:$0xff]   ;;  %v4742_v58 = vld [vmem:[#allocation5 + $0x174] ss:$8 sps:$4 sm:$0xff]  }
 0x20b   :  { %v4071_v3 = vadd.f32 %v4070_v59, %v6037_v5  ;;  %v4074_v21 = vadd.f32 %v1781_v62, %v6116_v1  ;;  %v1783_v10 = vpop.f32.mrb[15].mxu0  ;;  %3004 = vmatprep.subr.bf16.mxu0 %v4733_v51 }
 0x20c   :  { %v4073_v24 = vadd.f32 %v4072_v40, %v6039_v6  ;;  %v4076_v36 = vadd.f32 %v1783_v10, %v6121_v0  ;;  %2935 = vmatprep.mubr.bf16.mxu0 %v2464_v44 }
 0x20d   :  { %v4075_v38 = vadd.f32 %v4074_v21, %v6041_v7  ;;  %2936 = vmatmul.mubr.bf16.gmra.mrb[40].mxu0 %v2463_v60  ;;  %v2415_v5 = vmax.f32 %v4071_v3, 0.0 }
 0x20e   :  { %v4077_v19 = vadd.f32 %v4076_v36, %v6049_v11  ;;  %3005 = vmatpush1.bf16.msra.mxu0 %v4731_v2  ;;  %v2416_v31 = vmax.f32 %v4073_v24, 0.0  ;;  %v4740_v2 = vld [vmem:[#allocation5 + $0x170] ss:$8 sps:$4 sm:$0xff]  }
 0x20f   :  { %v2419_v43 = vmax.f32 %v4075_v38, 0.0  ;;  %3006 = vmatprep.subr.bf16.mxu0 %v4736_v12 }
 0x210   :  { %v2420_v16 = vmax.f32 %v4077_v19, 0.0  ;;  %v1787_v55 = vpop.f32.mrb[16].mxu0 }
 0x211   :  { %v4078_v29 = vadd.f32 %v1787_v55, %v6116_v1  ;;  %v1789_v6 = vpop.f32.mrb[17].mxu0  ;;  %v2467_v49 = vpack.c.bf16 %v2419_v43, %v2415_v5  ;;  %v4743_v5 = vld [vmem:[#allocation5 + $0x180] ss:$8 sps:$4 sm:$0xff]  }
 0x212   :  { %v4080_v51 = vadd.f32 %v1789_v6, %v6121_v0  ;;  %v1791_v54 = vpop.f32.mrb[18].mxu0  ;;  %v2468_v7 = vpack.c.bf16 %v2420_v16, %v2416_v31  ;;  %3007 = vmatpush1.bf16.msra.mxu0 %v4734_v41  ;;  %v4748_v31 = vld [vmem:[#allocation5 + $0x194] ss:$8 sps:$4 sm:$0xff]  }
 0x213   :  { %v4079_v11 = vadd.f32 %v4078_v29, %v6051_v13  ;;  %v4082_v39 = vadd.f32 %v1791_v54, %v6116_v1  ;;  %v1793_v59 = vpop.f32.mrb[19].mxu0  ;;  %3008 = vmatprep.subr.bf16.mxu0 %v4739_v45  ;;  %v4745_v13 = vld [vmem:[#allocation5 + $0x184] ss:$8 sps:$4 sm:$0xff]  }
 0x214   :  { %v4081_v60 = vadd.f32 %v4080_v51, %v6053_v14  ;;  %v4084_v40 = vadd.f32 %v1793_v59, %v6121_v0  ;;  %2945 = vmatprep.mubr.bf16.mxu0 %v2468_v7 }
 0x215   :  { %v4083_v62 = vadd.f32 %v4082_v39, %v6055_v15  ;;  %2946 = vmatmul.mubr.bf16.gmra.mrb[44].mxu0 %v2467_v49  ;;  %v2423_v3 = vmax.f32 %v4079_v11, 0.0  ;;  %v4746_v49 = vld [vmem:[#allocation5 + $0x190] ss:$8 sps:$4 sm:$0xff]  }
 0x216   :  { %v4085_v44 = vadd.f32 %v4084_v40, %v6057_v17  ;;  %3009 = vmatpush1.bf16.msra.mxu0 %v4737_v56  ;;  %v2424_v10 = vmax.f32 %v4081_v60, 0.0  ;;  %v4749_v40 = vld [vmem:[#allocation5 + $0x1a0] ss:$8 sps:$4 sm:$0xff]  }
 0x217   :  { %v2427_v21 = vmax.f32 %v4083_v62, 0.0  ;;  %3010 = vmatprep.subr.bf16.mxu0 %v4742_v58 }
 0x218   :  { %v2428_v12 = vmax.f32 %v4085_v44, 0.0  ;;  %v1797_v24 = vpop.f32.mrb[20].mxu0 }
 0x219   :  { %v4086_v36 = vadd.f32 %v1797_v24, %v6116_v1  ;;  %v1799_v14 = vpop.f32.mrb[21].mxu0  ;;  %v2471_v38 = vpack.c.bf16 %v2427_v21, %v2423_v3 }
 0x21a   :  { %v4088_v19 = vadd.f32 %v1799_v14, %v6121_v0  ;;  %v1801_v41 = vpop.f32.mrb[22].mxu0  ;;  %v2472_v15 = vpack.c.bf16 %v2428_v12, %v2424_v10  ;;  %3011 = vmatpush1.bf16.msra.mxu0 %v4740_v2  ;;  %v4754_v2 = vld [vmem:[#allocation5 + $0x1b4] ss:$8 sps:$4 sm:$0xff]   ;;  %v4752_v12 = vld [vmem:[#allocation5 + $0x1b0] ss:$8 sps:$4 sm:$0xff]  }
 0x21b   :  { %v4087_v17 = vadd.f32 %v4086_v36, %v6060_v18  ;;  %v4090_v43 = vadd.f32 %v1801_v41, %v6116_v1  ;;  %v1803_v45 = vpop.f32.mrb[23].mxu0  ;;  %3012 = vmatprep.subr.bf16.mxu0 %v4745_v13  ;;  %v4751_v18 = vld [vmem:[#allocation5 + $0x1a4] ss:$8 sps:$4 sm:$0xff]  }
 0x21c   :  { %v4089_v16 = vadd.f32 %v4088_v19, %v6062_v20  ;;  %v4092_v55 = vadd.f32 %v1803_v45, %v6121_v0  ;;  %2955 = vmatprep.mubr.bf16.mxu0 %v2472_v15 }
 0x21d   :  { %v4091_v29 = vadd.f32 %v4090_v43, %v6064_v22  ;;  %2956 = vmatmul.mubr.bf16.gmra.mrb[48].mxu0 %v2471_v38  ;;  %v2431_v51 = vmax.f32 %v4087_v17, 0.0  ;;  %v4755_v43 = vld [vmem:[#allocation5 + $0x1c0] ss:$8 sps:$4 sm:$0xff]  }
 0x21e   :  { %v4093_v6 = vadd.f32 %v4092_v55, %v6066_v25  ;;  %3013 = vmatpush1.bf16.msra.mxu0 %v4743_v5  ;;  %v2432_v7 = vmax.f32 %v4089_v16, 0.0  ;;  %v4760_v16 = vld [vmem:[#allocation5 + $0x1d4] ss:$8 sps:$4 sm:$0xff]  }
 0x21f   :  { %v2435_v54 = vmax.f32 %v4091_v29, 0.0  ;;  %3014 = vmatprep.subr.bf16.mxu0 %v4748_v31 }
 0x220   :  { %v2436_v56 = vmax.f32 %v4093_v6, 0.0  ;;  %v1807_v11 = vpop.f32.mrb[24].mxu0 }
 0x221   :  { %v4094_v39 = vadd.f32 %v1807_v11, %v6116_v1  ;;  %v1809_v20 = vpop.f32.mrb[25].mxu0  ;;  %v2475_v59 = vpack.c.bf16 %v2435_v54, %v2431_v51  ;;  %v4758_v54 = vld [vmem:[#allocation5 + $0x1d0] ss:$8 sps:$4 sm:$0xff]  }
 0x222   :  { %v4096_v58 = vadd.f32 %v1809_v20, %v6121_v0  ;;  %v1811_v60 = vpop.f32.mrb[26].mxu0  ;;  %v2476_v22 = vpack.c.bf16 %v2436_v56, %v2432_v7  ;;  %3015 = vmatpush1.bf16.msra.mxu0 %v4746_v49  ;;  %v472_v49 = vsub.s32 2, %v6107_v42  ;;  %v4763_v7 = vld [vmem:[#allocation5 + $0x1e4] ss:$8 sps:$4 sm:$0xff]   ;;  %v4766_v20 = vld [vmem:[#allocation5 + $0x1f4] ss:$8 sps:$4 sm:$0xff]  }
 0x223   :  { %v4095_v25 = vadd.f32 %v4094_v39, %v6071_v26  ;;  %v4098_v62 = vadd.f32 %v1811_v60, %v6116_v1  ;;  %v1813_v44 = vpop.f32.mrb[27].mxu0  ;;  %3016 = vmatprep.subr.bf16.mxu0 %v4751_v18  ;;  %v4757_v26 = vld [vmem:[#allocation5 + $0x1c4] ss:$8 sps:$4 sm:$0xff]  }
 0x224   :  { %v4097_v3 = vadd.f32 %v4096_v58, %v6073_v28  ;;  %v4100_v21 = vadd.f32 %v1813_v44, %v6121_v0  ;;  %2965 = vmatprep.mubr.bf16.mxu0 %v2476_v22 }
 0x225   :  { %v4099_v13 = vadd.f32 %v4098_v62, %v6075_v30  ;;  %2966 = vmatmul.mubr.bf16.gmra.mrb[52].mxu0 %v2475_v59  ;;  %v2439_v24 = vmax.f32 %v4095_v25, 0.0  ;;  %v4764_v25 = vld [vmem:[#allocation5 + $0x1f0] ss:$8 sps:$4 sm:$0xff]  }
 0x226   :  { %v4101_v10 = vadd.f32 %v4100_v21, %v6077_v32  ;;  %3017 = vmatpush1.bf16.msra.mxu0 %v4749_v40  ;;  %v2440_v14 = vmax.f32 %v4097_v3, 0.0 }
 0x227   :  { %v2443_v36 = vmax.f32 %v4099_v13, 0.0  ;;  %3018 = vmatprep.subr.bf16.mxu0 %v4754_v2 }
 0x228   :  { %v2444_v38 = vmax.f32 %v4101_v10, 0.0  ;;  %v1817_v19 = vpop.f32.mrb[28].mxu0 }
 0x229   :  { %v4102_v41 = vadd.f32 %v1817_v19, %v6116_v1  ;;  %v1819_v28 = vpop.f32.mrb[29].mxu0  ;;  %v2479_v15 = vpack.c.bf16 %v2443_v36, %v2439_v24 }
 0x22a   :  { %v4104_v5 = vadd.f32 %v1819_v28, %v6121_v0  ;;  %v1821_v17 = vpop.f32.mrb[30].mxu0  ;;  %v2480_v30 = vpack.c.bf16 %v2444_v38, %v2440_v14  ;;  %3019 = vmatpush1.bf16.msra.mxu0 %v4752_v12 }
 0x22b   :  { %v4103_v32 = vadd.f32 %v4102_v41, %v6082_v33  ;;  %v4106_v45 = vadd.f32 %v1821_v17, %v6116_v1  ;;  %v1823_v31 = vpop.f32.mrb[31].mxu0  ;;  %3020 = vmatprep.subr.bf16.mxu0 %v4757_v26  ;;  %v476_v33 = vsub.s32 3, %v6107_v42 }
 0x22c   :  { %v4105_v55 = vadd.f32 %v4104_v5, %v6084_v34  ;;  %v4108_v29 = vadd.f32 %v1823_v31, %v6121_v0  ;;  %2975 = vmatprep.mubr.bf16.mxu0 %v2480_v30  ;;  %v6256_v0 = vrot.slane %v6110_v47, %v472_v49 }
 0x22d   :  { %v4107_v6 = vadd.f32 %v4106_v45, %v6086_v8  ;;  %2976 = vmatmul.mubr.bf16.gmra.mrb[56].mxu0 %v2479_v15  ;;  %v2447_v1 = vmax.f32 %v4103_v32, 0.0  ;;  %v6259_v39 = vrot.slane %v6110_v47, %v476_v33 }
 0x22e   :  { %v4109_v51 = vadd.f32 %v4108_v29, %v6088_v35  ;;  %3021 = vmatpush1.bf16.msra.mxu0 %v4755_v43  ;;  %v2448_v56 = vmax.f32 %v4105_v55, 0.0  ;;  %v4761_v35 = vld [vmem:[#allocation5 + $0x1e0] ss:$8 sps:$4 sm:$0xff]  }
 0x22f   :  { %v2451_v18 = vmax.f32 %v4107_v6, 0.0  ;;  %3022 = vmatprep.subr.bf16.mxu0 %v4760_v16 }
 0x230   :  { %v2452_v34 = vmax.f32 %v4109_v51, 0.0 }
 0x231   :  { %v2483_v11 = vpack.c.bf16 %v2451_v18, %v2447_v1 }
 0x232   :  { %v2484_v8 = vpack.c.bf16 %v2452_v34, %v2448_v56  ;;  %3023 = vmatpush1.bf16.msra.mxu0 %v4758_v54 }
 0x233   :  { %3024 = vmatprep.subr.bf16.mxu0 %v4763_v7 }
 0x234   :  { %2985 = vmatprep.mubr.bf16.mxu0 %v2484_v8 }
 0x235   :  { %v2312_v59 = vpop.f32.mrb[32].mxu1  ;;  %2986 = vmatmul.mubr.bf16.gmra.mrb[60].mxu0 %v2483_v11 }
 0x236   :  { %v4110_v58 = vadd.f32 %v2312_v59, %v6256_v0  ;;  %v2314_v60 = vpop.f32.mrb[33].mxu1  ;;  %3025 = vmatpush1.bf16.msra.mxu0 %v4761_v35 }
 0x237   :  { %v4111_v22 = vadd.f32 %v2314_v60, %v6259_v39  ;;  %v2316_v40 = vpop.f32.mrb[34].mxu1  ;;  %3026 = vmatprep.subr.bf16.mxu0 %v4766_v20 }
 0x238   :  { %v4112_v62 = vadd.f32 %v2316_v40, %v6256_v0  ;;  %v2318_v44 = vpop.f32.mrb[35].mxu1  ;;  %v2393_v2 = vmax.f32 %v4110_v58, 0.0 }
 0x239   :  { %v4113_v47 = vadd.f32 %v2318_v44, %v6259_v39  ;;  %v2394_v21 = vmax.f32 %v4111_v22, 0.0 }
 0x23a   :  { %v2397_v3 = vmax.f32 %v4112_v62, 0.0  ;;  %3027 = vmatpush1.bf16.msra.mxu0 %v4764_v25 }
 0x23b   :  { %v2398_v13 = vmax.f32 %v4113_v47, 0.0  ;;  %3918 = vmatprep.subr.bf16.mxu0 %v6134_v4 }
 0x23c   :  { %v2457_v10 = vpack.c.bf16 %v2397_v3, %v2393_v2 }
 0x23d   :  { %v2458_v12 = vpack.c.bf16 %v2398_v13, %v2394_v21  ;;  %v2322_v24 = vpop.f32.mrb[36].mxu1 }
 0x23e   :  { %v4114_v36 = vadd.f32 %v2322_v24, %v6256_v0  ;;  %v2324_v26 = vpop.f32.mrb[37].mxu1 }
 0x23f   :  { %v4115_v14 = vadd.f32 %v2324_v26, %v6259_v39  ;;  %v2326_v38 = vpop.f32.mrb[38].mxu1  ;;  %3028 = vmatprep.mubr.bf16.mxu0 %v2458_v12 }
 0x240   :  { %v4116_v19 = vadd.f32 %v2326_v38, %v6256_v0  ;;  %v2328_v41 = vpop.f32.mrb[39].mxu1  ;;  %3029 = vmatmul.mubr.bf16.vlgmr.msra.gmra.mrb[32].mxu0 %v2457_v10  ;;  %v2401_v15 = vmax.f32 %v4114_v36, 0.0 }
 0x241   :  { %v4117_v28 = vadd.f32 %v2328_v41, %v6259_v39  ;;  %3919 = vmatpush3.bf16.msra.mxu0 %v6139_v23  ;;  %v2402_v4 = vmax.f32 %v4115_v14, 0.0 }
 0x242   :  { %v2405_v5 = vmax.f32 %v4116_v19, 0.0  ;;  %3920 = vmatprep.subr.bf16.mxu0 %v6146_v27 }
 0x243   :  { %v2406_v17 = vmax.f32 %v4117_v28, 0.0 }
 0x244   :  { %v2461_v30 = vpack.c.bf16 %v2405_v5, %v2401_v15 }
 0x245   :  { %v2462_v43 = vpack.c.bf16 %v2406_v17, %v2402_v4  ;;  %v2332_v32 = vpop.f32.mrb[40].mxu1  ;;  %3921 = vmatpush3.bf16.msra.mxu0 %v6158_v50 }
 0x246   :  { %v4118_v45 = vadd.f32 %v2332_v32, %v6256_v0  ;;  %v2334_v31 = vpop.f32.mrb[41].mxu1  ;;  %3922 = vmatprep.subr.bf16.mxu0 %v6164_v37 }
 0x247   :  { %v4119_v16 = vadd.f32 %v2334_v31, %v6259_v39  ;;  %v2336_v55 = vpop.f32.mrb[42].mxu1  ;;  %3038 = vmatprep.mubr.bf16.mxu0 %v2462_v43 }
 0x248   :  { %v4120_v23 = vadd.f32 %v2336_v55, %v6256_v0  ;;  %v2338_v29 = vpop.f32.mrb[43].mxu1  ;;  %3039 = vmatmul.mubr.bf16.gmra.mrb[36].mxu0 %v2461_v30  ;;  %v2409_v6 = vmax.f32 %v4118_v45, 0.0 }
 0x249   :  { %v4121_v27 = vadd.f32 %v2338_v29, %v6259_v39  ;;  %3923 = vmatpush3.bf16.msra.mxu0 %v6172_v63  ;;  %v2410_v50 = vmax.f32 %v4119_v16, 0.0 }
 0x24a   :  { %v2413_v49 = vmax.f32 %v4120_v23, 0.0  ;;  %3924 = vmatprep.subr.bf16.mxu0 %v6178_v9 }
 0x24b   :  { %v2414_v51 = vmax.f32 %v4121_v27, 0.0 }
 0x24c   :  { %v2465_v54 = vpack.c.bf16 %v2413_v49, %v2409_v6 }
 0x24d   :  { %v2466_v37 = vpack.c.bf16 %v2414_v51, %v2410_v50  ;;  %v2342_v33 = vpop.f32.mrb[44].mxu1  ;;  %3925 = vmatpush3.bf16.msra.mxu0 %v6190_v46 }
 0x24e   :  { %v4122_v1 = vadd.f32 %v2342_v33, %v6256_v0  ;;  %v2344_v18 = vpop.f32.mrb[45].mxu1  ;;  %3926 = vmatprep.subr.bf16.mxu0 %v6196_v52 }
 0x24f   :  { %v4123_v7 = vadd.f32 %v2344_v18, %v6259_v39  ;;  %v2346_v56 = vpop.f32.mrb[46].mxu1  ;;  %3048 = vmatprep.mubr.bf16.mxu0 %v2466_v37 }
 0x250   :  { %v4124_v63 = vadd.f32 %v2346_v56, %v6256_v0  ;;  %v2348_v34 = vpop.f32.mrb[47].mxu1  ;;  %3049 = vmatmul.mubr.bf16.gmra.mrb[40].mxu0 %v2465_v54  ;;  %v2417_v11 = vmax.f32 %v4122_v1, 0.0 }
 0x251   :  { %v4125_v9 = vadd.f32 %v2348_v34, %v6259_v39  ;;  %3927 = vmatpush3.bf16.msra.mxu0 %v6204_v57  ;;  %v2418_v46 = vmax.f32 %v4123_v7, 0.0 }
 0x252   :  { %v2421_v8 = vmax.f32 %v4124_v63, 0.0  ;;  %3928 = vmatprep.subr.bf16.mxu0 %v6210_v61 }
 0x253   :  { %v2422_v35 = vmax.f32 %v4125_v9, 0.0 }
 0x254   :  { %v2469_v20 = vpack.c.bf16 %v2421_v8, %v2417_v11 }
 0x255   :  { %v2470_v52 = vpack.c.bf16 %v2422_v35, %v2418_v46  ;;  %v2352_v59 = vpop.f32.mrb[48].mxu1  ;;  %v4778_v35 = vld [vmem:[%s6400_s5 + $0x28] sm:$0xff]  }
 0x256   :  { %v4126_v58 = vadd.f32 %v2352_v59, %v6256_v0  ;;  %v2354_v60 = vpop.f32.mrb[49].mxu1  ;;  %3929 = vmatpush3.bf16.msra.mxu0 %v4778_v35  ;;  %4043 = vmatpush3.bf16.msra.mxu1 %v4778_v35  ;;  %v4783_v59 = vld [vmem:[#allocation8] sm:$0xff]  }
 0x257   :  { %v4127_v22 = vadd.f32 %v2354_v60, %v6259_v39  ;;  %v2356_v40 = vpop.f32.mrb[50].mxu1  ;;  %3058 = vmatprep.mubr.bf16.mxu0 %v2470_v52  ;;  %v4782_v52 = vld [vmem:[%s6400_s5 + $0x38] sm:$0xff]  }
 0x258   :  { %v4128_v25 = vadd.f32 %v2356_v40, %v6256_v0  ;;  %v2358_v62 = vpop.f32.mrb[51].mxu1  ;;  %3059 = vmatmul.mubr.bf16.gmra.mrb[44].mxu0 %v2469_v20  ;;  %v2425_v44 = vmax.f32 %v4126_v58, 0.0  ;;  %v4781_v20 = vld [vmem:[%s6400_s5 + $0x78] sm:$0xff]   ;;  %v2551_v58 = vld [vmem:[%s6399_s4] sm:$0x3]  ;;  %s4941_s4 = smov [#allocation11]  }
 0x259   :  { %v4129_v57 = vadd.f32 %v2358_v62, %v6259_v39  ;;  %v2426_v47 = vmax.f32 %v4127_v22, 0.0  ;;  %v6324_v60 = vrot.slane %v2551_v58, %v464_v53  ;;  %v6328_v22 = vrot.slane %v2551_v58, %v468_v48 }
 0x25a   :  { %v2429_v61 = vmax.f32 %v4128_v25, 0.0 }
 0x25b   :  { %v2430_v2 = vmax.f32 %v4129_v57, 0.0 }
 0x25c   :  { %v2473_v3 = vpack.c.bf16 %v2429_v61, %v2425_v44 }
 0x25d   :  { %v2474_v21 = vpack.c.bf16 %v2430_v2, %v2426_v47  ;;  %v2362_v13 = vpop.f32.mrb[52].mxu1 }
 0x25e   :  { %v4130_v10 = vadd.f32 %v2362_v13, %v6256_v0  ;;  %v2364_v12 = vpop.f32.mrb[53].mxu1 }
 0x25f   :  { %v4131_v24 = vadd.f32 %v2364_v12, %v6259_v39  ;;  %v2366_v36 = vpop.f32.mrb[54].mxu1  ;;  %3068 = vmatprep.mubr.bf16.mxu0 %v2474_v21 }
 0x260   :  { %v4132_v26 = vadd.f32 %v2366_v36, %v6256_v0  ;;  %v2368_v14 = vpop.f32.mrb[55].mxu1  ;;  %3069 = vmatmul.mubr.bf16.gmra.mrb[48].mxu0 %v2473_v3  ;;  %v2433_v19 = vmax.f32 %v4130_v10, 0.0 }
 0x261   :  { %v4133_v38 = vadd.f32 %v2368_v14, %v6259_v39  ;;  %v2434_v28 = vmax.f32 %v4131_v24, 0.0 }
 0x262   :  { %v2437_v41 = vmax.f32 %v4132_v26, 0.0 }
 0x263   :  { %v2438_v15 = vmax.f32 %v4133_v38, 0.0 }
 0x264   :  { %v2477_v5 = vpack.c.bf16 %v2437_v41, %v2433_v19 }
 0x265   :  { %v2478_v4 = vpack.c.bf16 %v2438_v15, %v2434_v28  ;;  %v2372_v17 = vpop.f32.mrb[56].mxu1 }
 0x266   :  { %v4134_v30 = vadd.f32 %v2372_v17, %v6256_v0  ;;  %v2374_v43 = vpop.f32.mrb[57].mxu1 }
 0x267   :  { %v4135_v32 = vadd.f32 %v2374_v43, %v6259_v39  ;;  %v2376_v45 = vpop.f32.mrb[58].mxu1  ;;  %3078 = vmatprep.mubr.bf16.mxu0 %v2478_v4 }
 0x268   :  { %v4136_v31 = vadd.f32 %v2376_v45, %v6256_v0  ;;  %v2378_v16 = vpop.f32.mrb[59].mxu1  ;;  %3079 = vmatmul.mubr.bf16.gmra.mrb[52].mxu0 %v2477_v5  ;;  %v2441_v23 = vmax.f32 %v4134_v30, 0.0 }
 0x269   :  { %v4137_v55 = vadd.f32 %v2378_v16, %v6259_v39  ;;  %v2442_v27 = vmax.f32 %v4135_v32, 0.0 }
 0x26a   :  { %v2445_v29 = vmax.f32 %v4136_v31, 0.0 }
 0x26b   :  { %v2446_v6 = vmax.f32 %v4137_v55, 0.0 }
 0x26c   :  { %v2481_v49 = vpack.c.bf16 %v2445_v29, %v2441_v23 }
 0x26d   :  { %v2482_v50 = vpack.c.bf16 %v2446_v6, %v2442_v27  ;;  %v2382_v51 = vpop.f32.mrb[60].mxu1 }
 0x26e   :  { %v4138_v54 = vadd.f32 %v2382_v51, %v6256_v0  ;;  %v2384_v37 = vpop.f32.mrb[61].mxu1 }
 0x26f   :  { %v4139_v33 = vadd.f32 %v2384_v37, %v6259_v39  ;;  %v2386_v1 = vpop.f32.mrb[62].mxu1  ;;  %3088 = vmatprep.mubr.bf16.mxu0 %v2482_v50 }
 0x270   :  { %v4140_v18 = vadd.f32 %v2386_v1, %v6256_v0  ;;  %v2388_v7 = vpop.f32.mrb[63].mxu1  ;;  %3089 = vmatmul.mubr.bf16.gmra.mrb[56].mxu0 %v2481_v49  ;;  %v2449_v63 = vmax.f32 %v4138_v54, 0.0  ;;  %v4779_v0 = vld [vmem:[%s6400_s5 + $0x70] sm:$0xff]  }
 0x271   :  { %v4141_v56 = vadd.f32 %v2388_v7, %v6259_v39  ;;  %v2450_v9 = vmax.f32 %v4139_v33, 0.0  ;;  %v4780_v39 = vld [vmem:[%s6400_s5 + $0x30] sm:$0xff]   ;;  %3930 = vmatprep.subr.bf16.mxu0 %v4779_v0  ;;  %4036 = vmatprep.subr.bf16.mxu1 %v4779_v0  ;;  %s3602_s5 = sshll.u32 %s4941_s4, 4  ;;  %s3603_s5 = int_to_ptr.vmem [resolvable:$true] %s3602_s5 }
 0x272   :  { %v2453_v34 = vmax.f32 %v4140_v18, 0.0  ;;  %3931 = vmatpush3.bf16.msra.mxu0 %v4780_v39  ;;  %4044 = vmatpush3.bf16.msra.mxu1 %v4780_v39  ;;  %v4784_v1 = vld [vmem:[#allocation8 + $0x8] sm:$0xff]   ;;  %s4901_s29 = scalar_lea.vmem %s3603_s5, 2048  ;;  %p4906_p13 = scmp.lt.s32.totalorder %s3603_s5, %s3603_s5 }
 0x273   :  { %v2454_v11 = vmax.f32 %v4141_v56, 0.0  ;;  %3932 = vmatprep.subr.bf16.mxu0 %v4781_v20  ;;  %4037 = vmatprep.subr.bf16.mxu1 %v4781_v20  ;;  %p4902_p12 = scmp.ne.s32.totalorder %s3603_s5, %s4901_s29  ;;  %p4907_p0 = scmp.lt.s32.totalorder %s4901_s29, %s4901_s29 }
 0x274   :  { %v2485_v8 = vpack.c.bf16 %v2453_v34, %v2449_v63 }
 0x275   :  { %v2486_v46 = vpack.c.bf16 %v2454_v11, %v2450_v9  ;;  %p4908_p1 = por %p4907_p0, %p4906_p13 }
 0x276   :  { %3933 = vmatpush3.bf16.msra.mxu0 %v4782_v52  ;;  %4045 = vmatpush3.bf16.msra.mxu1 %v4782_v52 }
 0x277   :  { %3098 = vmatprep.mubr.bf16.mxu0 %v2486_v46  ;;  %3998 = vmatprep.subr.bf16.mxu1 %v4783_v59  ;;  %p4909_p2 = pnand %p4908_p1, %p4902_p12 }
 0x278   :  { %3099 = vmatmul.mubr.bf16.gmra.mrb[60].mxu0 %v2485_v8  ;;  %v4785_v8 = vld [vmem:[#allocation8 + $0x10] sm:$0xff]  }
 0x313   :  { %v3030_v40 = vpop.f32.mrb[32].mxu0 }
 0x314   :  { %v4142_v25 = vadd.f32 %v3030_v40, %v6324_v60  ;;  %v3032_v62 = vpop.f32.mrb[33].mxu0 }
 0x315   :  { %v4143_v57 = vadd.f32 %v3032_v62, %v6328_v22  ;;  %v3034_v44 = vpop.f32.mrb[34].mxu0 }
 0x316   :  { %v4144_v61 = vadd.f32 %v3034_v44, %v6324_v60  ;;  %v3036_v47 = vpop.f32.mrb[35].mxu0  ;;  %v3109_v3 = vmax.f32 %v4142_v25, 0.0 }
 0x317   :  { %v4145_v2 = vadd.f32 %v3036_v47, %v6328_v22  ;;  %v3110_v53 = vmax.f32 %v4143_v57, 0.0 }
 0x318   :  { %v3111_v21 = vmax.f32 %v4144_v61, 0.0 }
 0x319   :  { %v3112_v13 = vmax.f32 %v4145_v2, 0.0 }
 0x31a   :  { %v3141_v10 = vpack.c.bf16 %v3111_v21, %v3109_v3 }
 0x31b   :  { %v3142_v42 = vpack.c.bf16 %v3112_v13, %v3110_v53  ;;  %v3040_v48 = vpop.f32.mrb[36].mxu0 }
 0x31c   :  { %v4146_v12 = vadd.f32 %v3040_v48, %v6324_v60  ;;  %v3042_v24 = vpop.f32.mrb[37].mxu0 }
 0x31d   :  { %v4147_v36 = vadd.f32 %v3042_v24, %v6328_v22  ;;  %v3044_v26 = vpop.f32.mrb[38].mxu0  ;;  %3324 = vmatprep.mubr.bf16.mxu0 %v3142_v42 }
 0x31e   :  { %v4148_v14 = vadd.f32 %v3044_v26, %v6324_v60  ;;  %v3046_v38 = vpop.f32.mrb[39].mxu0  ;;  %3325 = vmatmul.mubr.bf16.vlgmr.msra.gmra.mrb[64].mxu0 %v3141_v10  ;;  %v3113_v41 = vmax.f32 %v4146_v12, 0.0 }
 0x31f   :  { %v4149_v19 = vadd.f32 %v3046_v38, %v6328_v22  ;;  %v3114_v15 = vmax.f32 %v4147_v36, 0.0 }
 0x320   :  { %v3115_v28 = vmax.f32 %v4148_v14, 0.0 }
 0x321   :  { %v3116_v5 = vmax.f32 %v4149_v19, 0.0 }
 0x322   :  { %v3143_v4 = vpack.c.bf16 %v3115_v28, %v3113_v41 }
 0x323   :  { %v3144_v17 = vpack.c.bf16 %v3116_v5, %v3114_v15  ;;  %v3050_v30 = vpop.f32.mrb[40].mxu0 }
 0x324   :  { %v4150_v43 = vadd.f32 %v3050_v30, %v6324_v60  ;;  %v3052_v32 = vpop.f32.mrb[41].mxu0 }
 0x325   :  { %v4151_v45 = vadd.f32 %v3052_v32, %v6328_v22  ;;  %v3054_v31 = vpop.f32.mrb[42].mxu0  ;;  %3332 = vmatprep.mubr.bf16.mxu0 %v3144_v17 }
 0x326   :  { %v4152_v16 = vadd.f32 %v3054_v31, %v6324_v60  ;;  %v3056_v55 = vpop.f32.mrb[43].mxu0  ;;  %3333 = vmatmul.mubr.bf16.gmra.mrb[68].mxu0 %v3143_v4  ;;  %v3117_v29 = vmax.f32 %v4150_v43, 0.0 }
 0x327   :  { %v4153_v23 = vadd.f32 %v3056_v55, %v6328_v22  ;;  %v3118_v6 = vmax.f32 %v4151_v45, 0.0 }
 0x328   :  { %v3119_v27 = vmax.f32 %v4152_v16, 0.0 }
 0x329   :  { %v3120_v49 = vmax.f32 %v4153_v23, 0.0 }
 0x32a   :  { %v3145_v50 = vpack.c.bf16 %v3119_v27, %v3117_v29 }
 0x32b   :  { %v3146_v51 = vpack.c.bf16 %v3120_v49, %v3118_v6  ;;  %v3060_v54 = vpop.f32.mrb[44].mxu0 }
 0x32c   :  { %v4154_v37 = vadd.f32 %v3060_v54, %v6324_v60  ;;  %v3062_v33 = vpop.f32.mrb[45].mxu0 }
 0x32d   :  { %v4155_v18 = vadd.f32 %v3062_v33, %v6328_v22  ;;  %v3064_v7 = vpop.f32.mrb[46].mxu0  ;;  %3340 = vmatprep.mubr.bf16.mxu1 %v3146_v51 }
 0x32e   :  { %v4156_v56 = vadd.f32 %v3064_v7, %v6324_v60  ;;  %v3066_v63 = vpop.f32.mrb[47].mxu0  ;;  %3341 = vmatmul.mubr.bf16.vlgmr.msra.gmra.mrb[64].mxu1 %v3145_v50  ;;  %v3121_v9 = vmax.f32 %v4154_v37, 0.0 }
 0x32f   :  { %v4157_v34 = vadd.f32 %v3066_v63, %v6328_v22  ;;  %3999 = vmatpush3.bf16.msra.mxu1 %v4783_v59  ;;  %v3122_v46 = vmax.f32 %v4155_v18, 0.0 }
 0x330   :  { %v3123_v11 = vmax.f32 %v4156_v56, 0.0  ;;  %4000 = vmatprep.subr.bf16.mxu1 %v4784_v1 }
 0x331   :  { %v3124_v35 = vmax.f32 %v4157_v34, 0.0 }
 0x332   :  { %v3147_v0 = vpack.c.bf16 %v3123_v11, %v3121_v9  ;;  %v4786_v11 = vld [vmem:[#allocation8 + $0x18] sm:$0xff]  }
 0x333   :  { %v3148_v39 = vpack.c.bf16 %v3124_v35, %v3122_v46  ;;  %v3070_v20 = vpop.f32.mrb[48].mxu0  ;;  %4001 = vmatpush3.bf16.msra.mxu1 %v4784_v1  ;;  %v4788_v46 = vld [vmem:[#allocation8 + $0x28] sm:$0xff]  }
 0x334   :  { %v4158_v52 = vadd.f32 %v3070_v20, %v6324_v60  ;;  %v3072_v58 = vpop.f32.mrb[49].mxu0  ;;  %4002 = vmatprep.subr.bf16.mxu1 %v4785_v8 }
 0x335   :  { %v4159_v40 = vadd.f32 %v3072_v58, %v6328_v22  ;;  %v3074_v25 = vpop.f32.mrb[50].mxu0  ;;  %3348 = vmatprep.mubr.bf16.mxu1 %v3148_v39 }
 0x336   :  { %v4160_v59 = vadd.f32 %v3074_v25, %v6324_v60  ;;  %v3076_v62 = vpop.f32.mrb[51].mxu0  ;;  %3349 = vmatmul.mubr.bf16.gmra.mrb[68].mxu1 %v3147_v0  ;;  %v3125_v44 = vmax.f32 %v4158_v52, 0.0  ;;  %v6362_v0 = vld [vmem:[#allocation7] ss:$0 sm:$0xff] }
 0x337   :  { %v4161_v57 = vadd.f32 %v3076_v62, %v6328_v22  ;;  %4003 = vmatpush3.bf16.msra.mxu1 %v4785_v8  ;;  %v3126_v47 = vmax.f32 %v4159_v40, 0.0  ;;  %v4787_v8 = vld [vmem:[#allocation8 + $0x20] sm:$0xff]  }
 0x338   :  { %v3127_v61 = vmax.f32 %v4160_v59, 0.0  ;;  %4004 = vmatprep.subr.bf16.mxu1 %v4786_v11 }
 0x339   :  { %v3128_v2 = vmax.f32 %v4161_v57, 0.0 }
 0x33a   :  { %v3149_v3 = vpack.c.bf16 %v3127_v61, %v3125_v44 }
 0x33b   :  { %v3150_v21 = vpack.c.bf16 %v3128_v2, %v3126_v47  ;;  %v3080_v53 = vpop.f32.mrb[52].mxu0  ;;  %4005 = vmatpush3.bf16.msra.mxu1 %v4786_v11 }
 0x33c   :  { %v4162_v13 = vadd.f32 %v3080_v53, %v6324_v60  ;;  %v3082_v10 = vpop.f32.mrb[53].mxu0  ;;  %4006 = vmatprep.subr.bf16.mxu1 %v4787_v8 }
 0x33d   :  { %v4163_v42 = vadd.f32 %v3082_v10, %v6328_v22  ;;  %v3084_v48 = vpop.f32.mrb[54].mxu0  ;;  %3356 = vmatprep.mubr.bf16.mxu1 %v3150_v21 }
 0x33e   :  { %v4164_v12 = vadd.f32 %v3084_v48, %v6324_v60  ;;  %v3086_v24 = vpop.f32.mrb[55].mxu0  ;;  %3357 = vmatmul.mubr.bf16.gmra.mrb[72].mxu1 %v3149_v3  ;;  %v3129_v26 = vmax.f32 %v4162_v13, 0.0 }
 0x33f   :  { %v4165_v36 = vadd.f32 %v3086_v24, %v6328_v22  ;;  %v3130_v38 = vmax.f32 %v4163_v42, 0.0  ;;  %4007 = vmatpush3.bf16.msra.mxu1 %v4787_v8 }
 0x340   :  { %v3131_v14 = vmax.f32 %v4164_v12, 0.0  ;;  %4008 = vmatprep.subr.bf16.mxu1 %v4788_v46 }
 0x341   :  { %v3132_v19 = vmax.f32 %v4165_v36, 0.0 }
 0x342   :  { %v3151_v41 = vpack.c.bf16 %v3131_v14, %v3129_v26 }
 0x343   :  { %v3152_v28 = vpack.c.bf16 %v3132_v19, %v3130_v38  ;;  %v3090_v15 = vpop.f32.mrb[56].mxu0  ;;  %4009 = vmatpush3.bf16.msra.mxu1 %v4788_v46 }
 0x344   :  { %v4166_v5 = vadd.f32 %v3090_v15, %v6324_v60  ;;  %v3092_v4 = vpop.f32.mrb[57].mxu0 }
 0x345   :  { %v4167_v17 = vadd.f32 %v3092_v4, %v6328_v22  ;;  %v3094_v30 = vpop.f32.mrb[58].mxu0  ;;  %3364 = vmatprep.mubr.bf16.mxu1 %v3152_v28 }
 0x346   :  { %v4168_v43 = vadd.f32 %v3094_v30, %v6324_v60  ;;  %v3096_v32 = vpop.f32.mrb[59].mxu0  ;;  %3365 = vmatmul.mubr.bf16.gmra.mrb[76].mxu1 %v3151_v41  ;;  %v3133_v31 = vmax.f32 %v4166_v5, 0.0 }
 0x347   :  { %v4169_v45 = vadd.f32 %v3096_v32, %v6328_v22  ;;  %v3134_v55 = vmax.f32 %v4167_v17, 0.0 }
 0x348   :  { %v3135_v16 = vmax.f32 %v4168_v43, 0.0 }
 0x349   :  { %v3136_v23 = vmax.f32 %v4169_v45, 0.0 }
 0x34a   :  { %v3153_v29 = vpack.c.bf16 %v3135_v16, %v3133_v31 }
 0x34b   :  { %v3154_v27 = vpack.c.bf16 %v3136_v23, %v3134_v55  ;;  %v3100_v6 = vpop.f32.mrb[60].mxu0 }
 0x34c   :  { %v4170_v49 = vadd.f32 %v3100_v6, %v6324_v60  ;;  %v3102_v50 = vpop.f32.mrb[61].mxu0 }
 0x34d   :  { %v4171_v51 = vadd.f32 %v3102_v50, %v6328_v22  ;;  %v3104_v54 = vpop.f32.mrb[62].mxu0  ;;  %3372 = vmatprep.mubr.bf16.mxu1 %v3154_v27 }
 0x34e   :  { %v4172_v37 = vadd.f32 %v3104_v54, %v6324_v60  ;;  %v3106_v33 = vpop.f32.mrb[63].mxu0  ;;  %3373 = vmatmul.mubr.bf16.gmra.mrb[80].mxu1 %v3153_v29  ;;  %v3137_v18 = vmax.f32 %v4170_v49, 0.0  ;;  %v4789_v60 = vld [vmem:[#allocation8 + $0x30] sm:$0xff]  }
 0x34f   :  { %v4173_v1 = vadd.f32 %v3106_v33, %v6328_v22  ;;  %v3138_v56 = vmax.f32 %v4171_v51, 0.0  ;;  %4010 = vmatprep.subr.bf16.mxu1 %v4789_v60  ;;  %v4790_v22 = vld [vmem:[#allocation8 + $0x38] sm:$0xff]  }
 0x350   :  { %v3139_v7 = vmax.f32 %v4172_v37, 0.0  ;;  %4011 = vmatpush3.bf16.msra.mxu1 %v4789_v60 }
 0x351   :  { %v3140_v63 = vmax.f32 %v4173_v1, 0.0  ;;  %4012 = vmatprep.subr.bf16.mxu1 %v4790_v22 }
 0x352   :  { %v3155_v34 = vpack.c.bf16 %v3139_v7, %v3137_v18 }
 0x353   :  { %v3156_v9 = vpack.c.bf16 %v3140_v63, %v3138_v56 }
 0x354   :  { %4013 = vmatpush3.bf16.msra.mxu1 %v4790_v22 }
 0x355   :  { %3380 = vmatprep.mubr.bf16.mxu1 %v3156_v9 }
 0x356   :  { %3381 = vmatmul.mubr.bf16.gmra.mrb[84].mxu1 %v3155_v34 }
 0x3f1   :  { %v3934_v35 = vpop.f32.mrb[64].mxu0 }
 0x3f2   :  { %v3935_v39 = vpop.f32.mrb[65].mxu0 }
 0x3f3   :  { %v3936_v20 = vadd.f32 %v3935_v39, %v3934_v35  ;;  %v3937_v52 = vpop.f32.mrb[66].mxu0 }
 0x3f4   :  { %v3938_v58 = vpop.f32.mrb[67].mxu0 }
 0x3f5   :  { %v3327_v40 = vadd.f32 %v3936_v20, %v6362_v0  ;;  %v3939_v25 = vadd.f32 %v3938_v58, %v3937_v52 }
 0x3f7   :  { %v3330_v59 = vadd.f32 %v3939_v25, %v6362_v0  ;;  %v3389_v62 = vmax.f32 %v3327_v40, 0.0 }
 0x3f9   :  { %v3390_v57 = vmax.f32 %v3330_v59, 0.0  ;;  %v3940_v44 = vpop.f32.mrb[68].mxu0 }
 0x3fa   :  { %v3941_v61 = vpop.f32.mrb[69].mxu0 }
 0x3fb   :  { %v3942_v47 = vadd.f32 %v3941_v61, %v3940_v44  ;;  %v3943_v2 = vpop.f32.mrb[70].mxu0  ;;  %v3405_v3 = vpack.c.bf16 %v3390_v57, %v3389_v62 }
 0x3fc   :  { %v3944_v21 = vpop.f32.mrb[71].mxu0 }
 0x3fd   :  { %v3335_v53 = vadd.f32 %v3942_v47, %v6362_v0  ;;  %v3945_v13 = vadd.f32 %v3944_v21, %v3943_v2  ;;  %4014 = vmatprep.mubr.bf16.mxu1 %v3405_v3 }
 0x3ff   :  { %v3338_v10 = vadd.f32 %v3945_v13, %v6362_v0  ;;  %v3391_v42 = vmax.f32 %v3335_v53, 0.0 }
 0x401   :  { %v3392_v48 = vmax.f32 %v3338_v10, 0.0  ;;  %v3946_v12 = vpop.f32.mrb[64].mxu1 }
 0x402   :  { %v3947_v24 = vpop.f32.mrb[65].mxu1 }
 0x403   :  { %v3406_v36 = vpack.c.bf16 %v3392_v48, %v3391_v42  ;;  %v3948_v26 = vadd.f32 %v3947_v24, %v3946_v12  ;;  %v3949_v14 = vpop.f32.mrb[66].mxu1 }
 0x404   :  { %v3950_v38 = vpop.f32.mrb[67].mxu1 }
 0x405   :  { %v3343_v19 = vadd.f32 %v3948_v26, %v6362_v0  ;;  %v3951_v41 = vadd.f32 %v3950_v38, %v3949_v14  ;;  %4015 = vmatmul.mubr.bf16.vlgmr.msra.gmra.mrb[88].mxu1 %v3406_v36  ;;  %v3909_v14 = vld [vmem:[#allocation10] ss:$0 sm:$0xff] }
 0x407   :  { %v3346_v28 = vadd.f32 %v3951_v41, %v6362_v0  ;;  %v3393_v15 = vmax.f32 %v3343_v19, 0.0 }
 0x409   :  { %v3394_v5 = vmax.f32 %v3346_v28, 0.0  ;;  %v3952_v4 = vpop.f32.mrb[68].mxu1 }
 0x40a   :  { %v3953_v17 = vpop.f32.mrb[69].mxu1 }
 0x40b   :  { %v3954_v30 = vadd.f32 %v3953_v17, %v3952_v4  ;;  %v3955_v43 = vpop.f32.mrb[70].mxu1  ;;  %v3407_v32 = vpack.c.bf16 %v3394_v5, %v3393_v15 }
 0x40c   :  { %v3956_v45 = vpop.f32.mrb[71].mxu1 }
 0x40d   :  { %v3351_v31 = vadd.f32 %v3954_v30, %v6362_v0  ;;  %v3957_v16 = vadd.f32 %v3956_v45, %v3955_v43  ;;  %4018 = vmatprep.mubr.bf16.mxu1 %v3407_v32 }
 0x40f   :  { %v3354_v55 = vadd.f32 %v3957_v16, %v6362_v0  ;;  %v3395_v23 = vmax.f32 %v3351_v31, 0.0 }
 0x411   :  { %v3396_v29 = vmax.f32 %v3354_v55, 0.0  ;;  %v3958_v27 = vpop.f32.mrb[72].mxu1 }
 0x412   :  { %v3959_v6 = vpop.f32.mrb[73].mxu1 }
 0x413   :  { %v3960_v49 = vadd.f32 %v3959_v6, %v3958_v27  ;;  %v3961_v50 = vpop.f32.mrb[74].mxu1  ;;  %v3408_v51 = vpack.c.bf16 %v3396_v29, %v3395_v23 }
 0x414   :  { %v3962_v54 = vpop.f32.mrb[75].mxu1 }
 0x415   :  { %v3359_v37 = vadd.f32 %v3960_v49, %v6362_v0  ;;  %v3963_v33 = vadd.f32 %v3962_v54, %v3961_v50  ;;  %4019 = vmatmul.mubr.bf16.gmra.mrb[92].mxu1 %v3408_v51 }
 0x417   :  { %v3362_v1 = vadd.f32 %v3963_v33, %v6362_v0  ;;  %v3397_v18 = vmax.f32 %v3359_v37, 0.0 }
 0x419   :  { %v3398_v7 = vmax.f32 %v3362_v1, 0.0  ;;  %v3964_v56 = vpop.f32.mrb[76].mxu1 }
 0x41a   :  { %v3965_v63 = vpop.f32.mrb[77].mxu1 }
 0x41b   :  { %v3966_v34 = vadd.f32 %v3965_v63, %v3964_v56  ;;  %v3967_v9 = vpop.f32.mrb[78].mxu1  ;;  %v3409_v11 = vpack.c.bf16 %v3398_v7, %v3397_v18 }
 0x41c   :  { %v3968_v8 = vpop.f32.mrb[79].mxu1 }
 0x41d   :  { %v3367_v46 = vadd.f32 %v3966_v34, %v6362_v0  ;;  %v3969_v60 = vadd.f32 %v3968_v8, %v3967_v9  ;;  %4022 = vmatprep.mubr.bf16.mxu1 %v3409_v11 }
 0x41f   :  { %v3370_v22 = vadd.f32 %v3969_v60, %v6362_v0  ;;  %v3399_v35 = vmax.f32 %v3367_v46, 0.0 }
 0x421   :  { %v3400_v39 = vmax.f32 %v3370_v22, 0.0  ;;  %v3970_v20 = vpop.f32.mrb[80].mxu1 }
 0x422   :  { %v3971_v52 = vpop.f32.mrb[81].mxu1 }
 0x423   :  { %v3972_v58 = vadd.f32 %v3971_v52, %v3970_v20  ;;  %v3973_v40 = vpop.f32.mrb[82].mxu1  ;;  %v3410_v25 = vpack.c.bf16 %v3400_v39, %v3399_v35 }
 0x424   :  { %v3974_v59 = vpop.f32.mrb[83].mxu1 }
 0x425   :  { %v3375_v62 = vadd.f32 %v3972_v58, %v6362_v0  ;;  %v3975_v57 = vadd.f32 %v3974_v59, %v3973_v40  ;;  %4023 = vmatmul.mubr.bf16.gmra.mrb[96].mxu1 %v3410_v25 }
 0x427   :  { %v3378_v44 = vadd.f32 %v3975_v57, %v6362_v0  ;;  %v3401_v61 = vmax.f32 %v3375_v62, 0.0 }
 0x429   :  { %v3402_v47 = vmax.f32 %v3378_v44, 0.0  ;;  %v3976_v2 = vpop.f32.mrb[84].mxu1 }
 0x42a   :  { %v3977_v3 = vpop.f32.mrb[85].mxu1 }
 0x42b   :  { %v3978_v21 = vadd.f32 %v3977_v3, %v3976_v2  ;;  %v3979_v53 = vpop.f32.mrb[86].mxu1  ;;  %v3411_v13 = vpack.c.bf16 %v3402_v47, %v3401_v61 }
 0x42c   :  { %v3980_v10 = vpop.f32.mrb[87].mxu1 }
 0x42d   :  { %v3383_v42 = vadd.f32 %v3978_v21, %v6362_v0  ;;  %v3981_v48 = vadd.f32 %v3980_v10, %v3979_v53  ;;  %4026 = vmatprep.mubr.bf16.mxu1 %v3411_v13 }
 0x42f   :  { %v3386_v12 = vadd.f32 %v3981_v48, %v6362_v0  ;;  %v3403_v24 = vmax.f32 %v3383_v42, 0.0 }
 0x431   :  { %v3404_v36 = vmax.f32 %v3386_v12, 0.0 }
 0x433   :  { %v3412_v26 = vpack.c.bf16 %v3404_v36, %v3403_v24 }
 0x435   :  { %4027 = vmatmul.mubr.bf16.gmra.mrb[100].mxu1 %v3412_v26 }
 0x4d8   :  { %v4016_v38 = vpop.f32.mrb[88].mxu1 }
 0x4d9   :  { %v3527_v19 = vadd.f32 %v4016_v38, %v3909_v14  ;;  %v3518_v41 = vpop.f32.mrb[89].mxu1 }
 0x4da   :  { %v3519_v28 = vadd.f32 %v3909_v14, %v3518_v41  ;;  %v4017_v15 = vpop.f32.mrb[90].mxu1 }
 0x4db   :  { %3583 = vst [vmem:[#allocation11 + $0x10] sm:$0xff] %v3527_v19  ;;  %v3530_v5 = vadd.f32 %v4017_v15, %v3909_v14  ;;  %v3521_v4 = vpop.f32.mrb[91].mxu1 }
 0x4dc   :  { %3581 = vst [vmem:[#allocation11] sm:$0xff] %v3519_v28  ;;  %v3522_v17 = vadd.f32 %v3909_v14, %v3521_v4 }
 0x4dd   :  { %3584 = vst [vmem:[#allocation11 + $0x18] sm:$0xff] %v3530_v5 }
 0x4de   :  { %3582 = vst [vmem:[#allocation11 + $0x8] sm:$0xff] %v3522_v17 }
 0x4e8   :  { %v4020_v30 = vpop.f32.mrb[92].mxu1 }
 0x4e9   :  { %v3543_v43 = vadd.f32 %v4020_v30, %v3909_v14  ;;  %v3534_v0 = vpop.f32.mrb[93].mxu1 }
 0x4ea   :  { %v3535_v32 = vadd.f32 %v3909_v14, %v3534_v0  ;;  %v4021_v45 = vpop.f32.mrb[94].mxu1 }
 0x4eb   :  { %3587 = vst [vmem:[#allocation11 + $0x30] sm:$0xff] %v3543_v43  ;;  %v3546_v31 = vadd.f32 %v4021_v45, %v3909_v14  ;;  %v3537_v16 = vpop.f32.mrb[95].mxu1 }
 0x4ec   :  { %3585 = vst [vmem:[#allocation11 + $0x20] sm:$0xff] %v3535_v32  ;;  %v3538_v55 = vadd.f32 %v3909_v14, %v3537_v16 }
 0x4ed   :  { %3588 = vst [vmem:[#allocation11 + $0x38] sm:$0xff] %v3546_v31 }
 0x4ee   :  { %3586 = vst [vmem:[#allocation11 + $0x28] sm:$0xff] %v3538_v55 }
 0x4f8   :  { %v4024_v23 = vpop.f32.mrb[96].mxu1 }
 0x4f9   :  { %v3559_v29 = vadd.f32 %v4024_v23, %v3909_v14  ;;  %v3550_v27 = vpop.f32.mrb[97].mxu1 }
 0x4fa   :  { %v3551_v6 = vadd.f32 %v3909_v14, %v3550_v27  ;;  %v4025_v49 = vpop.f32.mrb[98].mxu1 }
 0x4fb   :  { %3591 = vst [vmem:[#allocation11 + $0x50] sm:$0xff] %v3559_v29  ;;  %v3562_v50 = vadd.f32 %v4025_v49, %v3909_v14  ;;  %v3553_v51 = vpop.f32.mrb[99].mxu1 }
 0x4fc   :  { %3589 = vst [vmem:[#allocation11 + $0x40] sm:$0xff] %v3551_v6  ;;  %v3554_v54 = vadd.f32 %v3909_v14, %v3553_v51 }
 0x4fd   :  { %3592 = vst [vmem:[#allocation11 + $0x58] sm:$0xff] %v3562_v50 }
 0x4fe   :  { %3590 = vst [vmem:[#allocation11 + $0x48] sm:$0xff] %v3554_v54 }
 0x508   :  { %v4028_v37 = vpop.f32.mrb[100].mxu1 }
 0x509   :  { %v3575_v33 = vadd.f32 %v4028_v37, %v3909_v14  ;;  %v3566_v1 = vpop.f32.mrb[101].mxu1 }
 0x50a   :  { %v3567_v18 = vadd.f32 %v3909_v14, %v3566_v1  ;;  %v4029_v7 = vpop.f32.mrb[102].mxu1 }
 0x50b   :  { %3595 = vst [vmem:[#allocation11 + $0x70] sm:$0xff] %v3575_v33  ;;  %v3578_v56 = vadd.f32 %v4029_v7, %v3909_v14  ;;  %v3569_v63 = vpop.f32.mrb[103].mxu1 }
 0x50c   :  { %3593 = vst [vmem:[#allocation11 + $0x60] sm:$0xff] %v3567_v18  ;;  %v3570_v34 = vadd.f32 %v3909_v14, %v3569_v63 }
 0x50d   :  { %3596 = vst [vmem:[#allocation11 + $0x78] sm:$0xff] %v3578_v56 }
 0x50e   :  { %3594 = vst [vmem:[#allocation11 + $0x68] sm:$0xff] %v3570_v34 }
 0x50f   :  { %4912 = shalt.err (!%p4909_p2)
}
 0x510   :  { %s4913_s30 = scalar_lea.hbm %s6404_s9, 2048 }
 0x511   :  { %p4914_p3 = scmp.ne.s32.totalorder %s6404_s9, %s4913_s30  ;;  %p4917_p4 = scmp.lt.u32.totalorder %s4913_s30, %s6404_s9 }
 0x513   :  { %p4919_p5 = pnand %p4917_p4, %p4914_p3 }
 0x515   :  { %4922 = shalt.err (!%p4919_p5)
}
 0x516   :  { %3608 = dma.vmem_to_hbm [thread:$0]  %s3603_s5, 2048, %s6404_s9, [#allocation4], %s4932_s19, %s4932_s19, %s4933_s20  }
 0x517   :  { %4929 = dma.done.wait [#allocation4], 2048  }
 0x518   :  { %4930 = vsyncadd [#allocation4], 4294965248 }
 0x519   :  { %3612 = vsyncpa [#allocation3], 1 }
 0x51a   :  { %3613 = vsyncpa [#allocation6], 1 }
 0x51b   :  { %3614 = vsyncpa [#allocation9], 1 }
 0x51c   :  { %3615 = vsyncpa [#allocation4], 1 }

</bundles_post_ra>
